<compile_context>
chip_gen: v5e
topology: v5e:2x2
jax: 0.10.0
libtpu: 0.0.40
codegen_flags: <defaults>
</compile_context>

<pallas_src>
import jax
import jax.numpy as jnp
from jax import lax
from jax.experimental import pallas as pl
from jax.experimental.pallas import tpu as pltpu


def _leaky_relu(v, slope=0.1):
    # module uses nn.LeakyReLU(0.1)
    return jnp.where(v >= 0, v, slope * v)


def _round_up(v, m):
    return (v + m - 1) // m * m


def gnn_head_kernel(x_ref, h_ref, p_ref, a1_ref, a2_ref, w_ref,
                    o_ref, het_ref, idg_ref):
    """One HCHA head per grid step; output linear accumulated into o_ref."""
    head = pl.program_id(0)

    x = x_ref[...]                       # (N, Fin)
    Hm = h_ref[...]                      # (N, E)  incidence (zero-padded)

    # ---- head-invariant terms, computed once at head 0 ----------------------
    @pl.when(head == 0)
    def _():
        # he^T = x^T @ H  (Fin, E): unnormalized hyperedge features, stored
        # transposed so E stays the lane-dense last dim (no transpose later).
        het_ref[...] = lax.dot_general(
            x, Hm, (((0,), (0,)), ((), ())),
            preferred_element_type=jnp.float32)
        deg = jnp.sum(Hm, axis=0, keepdims=True)               # (1, E)
        # guarded reciprocal: zero-degree / padded edges contribute exactly 0
        idg_ref[...] = jnp.where(deg > 0.0, 1.0 / deg, 0.0)
        o_ref[...] = jnp.zeros_like(o_ref)

    p = p_ref[0]                          # (Fin, Fout)
    a1 = a1_ref[0]                        # (Fout, 1)
    a2 = a2_ref[0]                        # (Fout, 1)
    w_h = w_ref[0]                        # (Fout, Fout) this head's slice of W^T

    # ---- attention logits ----------------------------------------------------
    xp = jnp.dot(x, p, preferred_element_type=jnp.float32)        # (N, Fout)
    att_n = jnp.dot(xp, a1, preferred_element_type=jnp.float32)   # (N, 1)
    # (he @ p @ a2)^T == (p @ a2)^T contracted with he^T; diag(1/deg) is folded
    # onto the resulting (1, E) row instead of an (E, Fin)/(N, E) tensor.
    pa2 = jnp.dot(p, a2, preferred_element_type=jnp.float32)      # (Fin, 1)
    att_e = lax.dot_general(pa2, het_ref[...], (((0,), (0,)), ((), ())),
                            preferred_element_type=jnp.float32)   # (1, E)
    att_e = att_e * idg_ref[...]

    att = att_n + att_e                                            # (N, E)
    att = jnp.tanh(att * 0.125) * 8.0
    att = _leaky_relu(att)

    # ---- attention matrix, row-normalized ------------------------------------
    A = jnp.exp(att) * Hm                                          # (N, E)
    rs = jnp.sum(A, axis=-1, keepdims=True)                        # (N, 1)
    A = A * jnp.where(rs > 0.0, 1.0 / rs, 0.0)

    # ---- propagation: out = A @ diag(1/colsum(A)) @ (A^T @ xp) ---------------
    # diag(rowsum(A)) == I after row-normalization (torch's D**-0.5 is a
    # discarded no-op), so D is dropped entirely.
    n_rows = x.shape[0]
    t = lax.dot_general(A, xp, (((0,), (0,)), ((), ())),
                        preferred_element_type=jnp.float32)        # (E, Fout)
    cs = lax.dot_general(A, jnp.ones((n_rows, 1), jnp.float32),
                         (((0,), (0,)), ((), ())),
                         preferred_element_type=jnp.float32)       # (E, 1) colsum
    t = t * jnp.where(cs > 0.0, 1.0 / cs, 0.0)                     # fold diag(B) into t
    out_h = jnp.dot(A, t, preferred_element_type=jnp.float32)      # (N, Fout)
    out_h = _leaky_relu(out_h)

    # ---- fused output linear, accumulated across the head grid axis ----------
    o_ref[...] += jnp.dot(out_h, w_h, preferred_element_type=jnp.float32)


def _pad_to(a, shape):
    return jnp.pad(a, [(0, s - d) for d, s in zip(a.shape, shape)])


@jax.jit
def gnn_layer(x, H, p, a1, a2, w):
    num_heads, fin, fout = p.shape
    n, e = H.shape

    # lane-dense shapes: last dims -> multiples of 128, node dim -> multiple of 8
    n_p = _round_up(n, 8)
    e_p = _round_up(e, 128)
    fi_p = _round_up(fin, 128)
    fo_p = _round_up(fout, 128)

    x_p = _pad_to(x, (n_p, fi_p))
    H_p = _pad_to(H, (n_p, e_p))
    p_p = _pad_to(p, (num_heads, fi_p, fo_p))
    a1_p = _pad_to(a1, (num_heads, fo_p, 1))
    a2_p = _pad_to(a2, (num_heads, fo_p, 1))
    # nn.Linear(bias=False): y = cat @ W^T ; per-head (Fout, Fout) slices of W^T
    w_p = _pad_to(w.T.reshape(num_heads, fout, fout), (num_heads, fo_p, fo_p))

    # per-call VMEM footprint (f32) + ~25% headroom, capped well under the
    # smallest physical limit (v7x: 64 MiB per TensorCore).
    est = 4 * (n_p * fi_p + 3 * n_p * e_p + 3 * n_p * fo_p
               + fi_p * e_p + e_p * (fo_p + 4)
               + 4 * fi_p * fo_p + 4 * fo_p * fo_p)
    vmem_limit = int(min(max(est * 1.25, 16 * 2**20), 48 * 2**20))

    out = pl.pallas_call(
        gnn_head_kernel,
        out_shape=jax.ShapeDtypeStruct((n_p, fo_p), jnp.float32),
        grid=(num_heads,),
        in_specs=[
            pl.BlockSpec((n_p, fi_p), lambda h: (0, 0)),         # x   (head-invariant)
            pl.BlockSpec((n_p, e_p), lambda h: (0, 0)),          # H   (head-invariant)
            pl.BlockSpec((1, fi_p, fo_p), lambda h: (h, 0, 0)),  # p[head]
            pl.BlockSpec((1, fo_p, 1), lambda h: (h, 0, 0)),     # a1[head]
            pl.BlockSpec((1, fo_p, 1), lambda h: (h, 0, 0)),     # a2[head]
            pl.BlockSpec((1, fo_p, fo_p), lambda h: (h, 0, 0)),  # W^T[head]
        ],
        out_specs=pl.BlockSpec((n_p, fo_p), lambda h: (0, 0)),   # resident accumulator
        scratch_shapes=[
            pltpu.VMEM((fi_p, e_p), jnp.float32),  # he^T (head-invariant)
            pltpu.VMEM((1, e_p), jnp.float32),     # 1 / deg
        ],
        compiler_params=pltpu.CompilerParams(
            dimension_semantics=("arbitrary",),    # heads accumulate into o_ref
            vmem_limit_bytes=vmem_limit,
        ),
    )(x_p, H_p, p_p, a1_p, a2_p, w_p)

    return out[:n, :fout]


def gnn_ref(x, H, p, a1, a2, w):
    """Pure-JAX reference mirroring the PyTorch forward exactly."""
    outs = []
    for h in range(p.shape[0]):
        he = H.T @ x
        he = he / jnp.sum(H.T, -1, keepdims=True)
        xp = x @ p[h]
        hep = he @ p[h]
        att = xp @ a1[h] + (hep @ a2[h]).T
        att = jnp.tanh(att / 8.0) * 8.0
        att = jnp.where(att >= 0, att, 0.1 * att)
        A = jnp.exp(att) * H
        A = A / jnp.sum(A, -1, keepdims=True)
        B = jnp.diag(1.0 / jnp.sum(A, -2))
        D = jnp.diag(jnp.sum(A, -1))   # torch's ** -0.5 is a discarded no-op
        o = D @ A @ B @ A.T @ D @ xp
        outs.append(jnp.where(o >= 0, o, 0.1 * o))
    x_cat = jnp.concatenate(outs, -1)
    return x_cat @ w.T


if __name__ == "__main__":
    node_size, edge_size = 16, 8
    in_dim, out_dim, num_heads = 8, 8, 4

    key = jax.random.PRNGKey(0)
    k1, k2, k3, k4, k5, k6 = jax.random.split(key, 6)

    x = jax.random.normal(k1, (node_size, in_dim), jnp.float32)
    # strictly positive incidence weights -> no zero-degree edges / empty rows
    H = jax.random.uniform(k2, (node_size, edge_size), jnp.float32,
                           minval=0.1, maxval=1.0)
    p = jax.random.normal(k3, (num_heads, in_dim, out_dim), jnp.float32)
    a1 = jax.random.normal(k4, (num_heads, out_dim, 1), jnp.float32)
    a2 = jax.random.normal(k5, (num_heads, out_dim, 1), jnp.float32)
    w = jax.random.normal(k6, (out_dim, num_heads * out_dim), jnp.float32) * 0.1

    out = jax.block_until_ready(gnn_layer(x, H, p, a1, a2, w))
    ref = gnn_ref(x, H, p, a1, a2, w)

    assert out.shape == (node_size, out_dim)
    assert jnp.allclose(out, ref, rtol=1e-4, atol=1e-4), "mismatch vs reference"

    print("KERNEL_OK")
</pallas_src>

<mosaic_0001>
module attributes {stable_mosaic.version = 11 : i64} {
  func.func @gnn_head_kernel(%arg0: i32, %arg1: memref<16x128xf32, #tpu.memory_space<vmem>>, %arg2: memref<16x128xf32, #tpu.memory_space<vmem>>, %arg3: memref<1x128x128xf32, #tpu.memory_space<vmem>>, %arg4: memref<1x128x1xf32, #tpu.memory_space<vmem>>, %arg5: memref<1x128x1xf32, #tpu.memory_space<vmem>>, %arg6: memref<1x128x128xf32, #tpu.memory_space<vmem>>, %arg7: memref<16x128xf32, #tpu.memory_space<vmem>>, %arg8: memref<128x128xf32, #tpu.memory_space<vmem>>, %arg9: memref<1x128xf32, #tpu.memory_space<vmem>>) attributes {dimension_semantics = [#tpu.dimension_semantics<arbitrary>], iteration_bounds = array<i64: 4>, scalar_prefetch = 0 : i64, scratch_operands = 2 : i64, tpu.core_type = #tpu.core_type<tc>, window_params = [{pipeline_mode = #tpu.pipeline_mode<synchronous>, transform_indices = @transform_0, window_bounds = array<i64: 16, 128>}, {pipeline_mode = #tpu.pipeline_mode<synchronous>, transform_indices = @transform_1, window_bounds = array<i64: 16, 128>}, {transform_indices = @transform_2, window_bounds = array<i64: 1, 128, 128>}, {transform_indices = @transform_3, window_bounds = array<i64: 1, 128, 1>}, {transform_indices = @transform_4, window_bounds = array<i64: 1, 128, 1>}, {transform_indices = @transform_5, window_bounds = array<i64: 1, 128, 128>}, {pipeline_mode = #tpu.pipeline_mode<synchronous>, transform_indices = @transform_6, window_bounds = array<i64: 16, 128>}]} {
    %c0 = arith.constant 0 : index
    %c0_0 = arith.constant 0 : index
    %0 = vector.load %arg1[%c0, %c0_0] : memref<16x128xf32, #tpu.memory_space<vmem>>, vector<16x128xf32>
    %c0_1 = arith.constant 0 : index
    %c0_2 = arith.constant 0 : index
    %1 = vector.load %arg2[%c0_1, %c0_2] : memref<16x128xf32, #tpu.memory_space<vmem>>, vector<16x128xf32>
    %c0_i32 = arith.constant 0 : i32
    %2 = arith.cmpi eq, %arg0, %c0_i32 : i32
    %3 = arith.extui %2 : i1 to i32
    %c0_i32_3 = arith.constant 0 : i32
    %4 = arith.cmpi ne, %3, %c0_i32_3 : i32
    scf.if %4 {
      %cst_45 = arith.constant dense<0.000000e+00> : vector<128x128xf32>
      %66 = tpu.matmul %0, %1, %cst_45 {dimension_numbers = #tpu.dot_dimension_numbers<[0], [0], [1], [1], [0, 1, 1, 1], [], []>} : vector<16x128xf32>, vector<16x128xf32>, vector<128x128xf32> -> vector<128x128xf32>
      %c0_46 = arith.constant 0 : index
      %c0_47 = arith.constant 0 : index
      %67 = vector.load %arg8[%c0_46, %c0_47] : memref<128x128xf32, #tpu.memory_space<vmem>>, vector<128x128xf32>
      tpu.vector_store %arg8[%c0_46, %c0_47], %66 {strides = array<i32>} : memref<128x128xf32, #tpu.memory_space<vmem>>, vector<128x128xf32>,
      %cst_48 = arith.constant dense<0.000000e+00> : vector<128xf32>
      %68 = vector.multi_reduction <add>, %1, %cst_48 [0] : vector<16x128xf32> to vector<128xf32>
      %69 = vector.shape_cast %68 : vector<128xf32> to vector<1x128xf32>
      %cst_49 = arith.constant 0.000000e+00 : f32
      %70 = vector.broadcast %cst_49 : f32 to vector<1x128xf32>
      %71 = arith.cmpf ogt, %69, %70 : vector<1x128xf32>
      %cst_50 = arith.constant 1.000000e+00 : f32
      %72 = vector.broadcast %cst_50 : f32 to vector<1x128xf32>
      %73 = arith.divf %72, %69 : vector<1x128xf32>
      %cst_51 = arith.constant 0.000000e+00 : f32
      %74 = vector.broadcast %cst_51 : f32 to vector<1x128xf32>
      %75 = arith.select %71, %73, %74 : vector<1x128xi1>, vector<1x128xf32>
      %c0_52 = arith.constant 0 : index
      %c0_53 = arith.constant 0 : index
      %76 = vector.load %arg9[%c0_52, %c0_53] : memref<1x128xf32, #tpu.memory_space<vmem>>, vector<1x128xf32>
      tpu.vector_store %arg9[%c0_52, %c0_53], %75 {strides = array<i32>} : memref<1x128xf32, #tpu.memory_space<vmem>>, vector<1x128xf32>,
      %cst_54 = arith.constant 0.000000e+00 : f32
      %77 = vector.broadcast %cst_54 : f32 to vector<16x128xf32>
      %c0_55 = arith.constant 0 : index
      %c0_56 = arith.constant 0 : index
      %78 = vector.load %arg7[%c0_55, %c0_56] : memref<16x128xf32, #tpu.memory_space<vmem>>, vector<16x128xf32>
      tpu.vector_store %arg7[%c0_55, %c0_56], %77 {strides = array<i32>} : memref<16x128xf32, #tpu.memory_space<vmem>>, vector<16x128xf32>,
    } else {
    }
    %c0_4 = arith.constant 0 : index
    %c0_5 = arith.constant 0 : index
    %c0_6 = arith.constant 0 : index
    %5 = vector.load %arg3[%c0_4, %c0_5, %c0_6] : memref<1x128x128xf32, #tpu.memory_space<vmem>>, vector<1x128x128xf32>
    %6 = vector.shape_cast %5 : vector<1x128x128xf32> to vector<128x128xf32>
    %c0_7 = arith.constant 0 : index
    %c0_8 = arith.constant 0 : index
    %c0_9 = arith.constant 0 : index
    %7 = vector.load %arg4[%c0_7, %c0_8, %c0_9] : memref<1x128x1xf32, #tpu.memory_space<vmem>>, vector<1x128x1xf32>
    %8 = vector.shape_cast %7 : vector<1x128x1xf32> to vector<128x1xf32>
    %c0_10 = arith.constant 0 : index
    %c0_11 = arith.constant 0 : index
    %c0_12 = arith.constant 0 : index
    %9 = vector.load %arg5[%c0_10, %c0_11, %c0_12] : memref<1x128x1xf32, #tpu.memory_space<vmem>>, vector<1x128x1xf32>
    %10 = vector.shape_cast %9 : vector<1x128x1xf32> to vector<128x1xf32>
    %c0_13 = arith.constant 0 : index
    %c0_14 = arith.constant 0 : index
    %c0_15 = arith.constant 0 : index
    %11 = vector.load %arg6[%c0_13, %c0_14, %c0_15] : memref<1x128x128xf32, #tpu.memory_space<vmem>>, vector<1x128x128xf32>
    %12 = vector.shape_cast %11 : vector<1x128x128xf32> to vector<128x128xf32>
    %cst = arith.constant dense<0.000000e+00> : vector<16x128xf32>
    %13 = tpu.matmul %0, %6, %cst {dimension_numbers = #tpu.dot_dimension_numbers<[1], [0], [0], [1], [0, 0, 1, 1], [], []>} : vector<16x128xf32>, vector<128x128xf32>, vector<16x128xf32> -> vector<16x128xf32>
    %cst_16 = arith.constant dense<0.000000e+00> : vector<16x1xf32>
    %14 = tpu.matmul %13, %8, %cst_16 {dimension_numbers = #tpu.dot_dimension_numbers<[1], [0], [0], [1], [0, 0, 1, 1], [], []>} : vector<16x128xf32>, vector<128x1xf32>, vector<16x1xf32> -> vector<16x1xf32>
    %cst_17 = arith.constant dense<0.000000e+00> : vector<128x1xf32>
    %15 = tpu.matmul %6, %10, %cst_17 {dimension_numbers = #tpu.dot_dimension_numbers<[1], [0], [0], [1], [0, 0, 1, 1], [], []>} : vector<128x128xf32>, vector<128x1xf32>, vector<128x1xf32> -> vector<128x1xf32>
    %c0_18 = arith.constant 0 : index
    %c0_19 = arith.constant 0 : index
    %16 = vector.load %arg8[%c0_18, %c0_19] : memref<128x128xf32, #tpu.memory_space<vmem>>, vector<128x128xf32>
    %cst_20 = arith.constant dense<0.000000e+00> : vector<1x128xf32>
    %17 = tpu.matmul %15, %16, %cst_20 {dimension_numbers = #tpu.dot_dimension_numbers<[0], [0], [1], [1], [0, 1, 1, 1], [], []>} : vector<128x1xf32>, vector<128x128xf32>, vector<1x128xf32> -> vector<1x128xf32>
    %c0_21 = arith.constant 0 : index
    %c0_22 = arith.constant 0 : index
    %18 = vector.load %arg9[%c0_21, %c0_22] : memref<1x128xf32, #tpu.memory_space<vmem>>, vector<1x128xf32>
    %19 = arith.mulf %17, %18 : vector<1x128xf32>
    %20 = vector.broadcast %14 : vector<16x1xf32> to vector<16x128xf32>
    %21 = vector.broadcast %19 : vector<1x128xf32> to vector<16x128xf32>
    %22 = arith.addf %20, %21 : vector<16x128xf32>
    %cst_23 = arith.constant 1.250000e-01 : f32
    %23 = vector.broadcast %cst_23 : f32 to vector<16x128xf32>
    %24 = arith.mulf %22, %23 : vector<16x128xf32>
    %25 = math.tanh %24 : vector<16x128xf32>
    %cst_24 = arith.constant 8.000000e+00 : f32
    %26 = vector.broadcast %cst_24 : f32 to vector<16x128xf32>
    %27 = arith.mulf %25, %26 : vector<16x128xf32>
    %cst_25 = arith.constant 0.000000e+00 : f32
    %28 = vector.broadcast %cst_25 : f32 to vector<16x128xf32>
    %29 = arith.cmpf oge, %27, %28 : vector<16x128xf32>
    %cst_26 = arith.constant 1.000000e-01 : f32
    %30 = vector.broadcast %cst_26 : f32 to vector<16x128xf32>
    %31 = arith.mulf %30, %27 : vector<16x128xf32>
    %32 = arith.select %29, %27, %31 : vector<16x128xi1>, vector<16x128xf32>
    %33 = math.exp %32 : vector<16x128xf32>
    %34 = arith.mulf %33, %1 : vector<16x128xf32>
    %cst_27 = arith.constant dense<0.000000e+00> : vector<16xf32>
    %35 = vector.multi_reduction <add>, %34, %cst_27 [1] : vector<16x128xf32> to vector<16xf32>
    %36 = vector.shape_cast %35 : vector<16xf32> to vector<16x1xf32>
    %cst_28 = arith.constant 0.000000e+00 : f32
    %37 = vector.broadcast %cst_28 : f32 to vector<16x1xf32>
    %38 = arith.cmpf ogt, %36, %37 : vector<16x1xf32>
    %cst_29 = arith.constant 1.000000e+00 : f32
    %39 = vector.broadcast %cst_29 : f32 to vector<16x1xf32>
    %40 = arith.divf %39, %36 : vector<16x1xf32>
    %cst_30 = arith.constant 0.000000e+00 : f32
    %41 = vector.broadcast %cst_30 : f32 to vector<16x1xf32>
    %42 = arith.select %38, %40, %41 : vector<16x1xi1>, vector<16x1xf32>
    %43 = vector.broadcast %42 : vector<16x1xf32> to vector<16x128xf32>
    %44 = arith.mulf %34, %43 : vector<16x128xf32>
    %cst_31 = arith.constant dense<0.000000e+00> : vector<128x128xf32>
    %45 = tpu.matmul %44, %13, %cst_31 {dimension_numbers = #tpu.dot_dimension_numbers<[0], [0], [1], [1], [0, 1, 1, 1], [], []>} : vector<16x128xf32>, vector<16x128xf32>, vector<128x128xf32> -> vector<128x128xf32>
    %cst_32 = arith.constant 1.000000e+00 : f32
    %46 = vector.broadcast %cst_32 : f32 to vector<16x1xf32>
    %cst_33 = arith.constant dense<0.000000e+00> : vector<128x1xf32>
    %47 = tpu.matmul %44, %46, %cst_33 {dimension_numbers = #tpu.dot_dimension_numbers<[0], [0], [1], [1], [0, 1, 1, 1], [], []>} : vector<16x128xf32>, vector<16x1xf32>, vector<128x1xf32> -> vector<128x1xf32>
    %cst_34 = arith.constant 0.000000e+00 : f32
    %48 = vector.broadcast %cst_34 : f32 to vector<128x1xf32>
    %49 = arith.cmpf ogt, %47, %48 : vector<128x1xf32>
    %cst_35 = arith.constant 1.000000e+00 : f32
    %50 = vector.broadcast %cst_35 : f32 to vector<128x1xf32>
    %51 = arith.divf %50, %47 : vector<128x1xf32>
    %cst_36 = arith.constant 0.000000e+00 : f32
    %52 = vector.broadcast %cst_36 : f32 to vector<128x1xf32>
    %53 = arith.select %49, %51, %52 : vector<128x1xi1>, vector<128x1xf32>
    %54 = vector.broadcast %53 : vector<128x1xf32> to vector<128x128xf32>
    %55 = arith.mulf %45, %54 : vector<128x128xf32>
    %cst_37 = arith.constant dense<0.000000e+00> : vector<16x128xf32>
    %56 = tpu.matmul %44, %55, %cst_37 {dimension_numbers = #tpu.dot_dimension_numbers<[1], [0], [0], [1], [0, 0, 1, 1], [], []>} : vector<16x128xf32>, vector<128x128xf32>, vector<16x128xf32> -> vector<16x128xf32>
    %cst_38 = arith.constant 0.000000e+00 : f32
    %57 = vector.broadcast %cst_38 : f32 to vector<16x128xf32>
    %58 = arith.cmpf oge, %56, %57 : vector<16x128xf32>
    %cst_39 = arith.constant 1.000000e-01 : f32
    %59 = vector.broadcast %cst_39 : f32 to vector<16x128xf32>
    %60 = arith.mulf %59, %56 : vector<16x128xf32>
    %61 = arith.select %58, %56, %60 : vector<16x128xi1>, vector<16x128xf32>
    %c0_40 = arith.constant 0 : index
    %c0_41 = arith.constant 0 : index
    %62 = vector.load %arg7[%c0_40, %c0_41] : memref<16x128xf32, #tpu.memory_space<vmem>>, vector<16x128xf32>
    %cst_42 = arith.constant dense<0.000000e+00> : vector<16x128xf32>
    %63 = tpu.matmul %61, %12, %cst_42 {dimension_numbers = #tpu.dot_dimension_numbers<[1], [0], [0], [1], [0, 0, 1, 1], [], []>} : vector<16x128xf32>, vector<128x128xf32>, vector<16x128xf32> -> vector<16x128xf32>
    %64 = arith.addf %62, %63 : vector<16x128xf32>
    %c0_43 = arith.constant 0 : index
    %c0_44 = arith.constant 0 : index
    %65 = vector.load %arg7[%c0_43, %c0_44] : memref<16x128xf32, #tpu.memory_space<vmem>>, vector<16x128xf32>
    tpu.vector_store %arg7[%c0_43, %c0_44], %64 {strides = array<i32>} : memref<16x128xf32, #tpu.memory_space<vmem>>, vector<16x128xf32>,
    return
  }
  func.func @transform_0(%arg0: i32) -> (i32, i32) {
    %c0_i32 = arith.constant 0 : i32
    %c0_i32_0 = arith.constant 0 : i32
    %c0_i32_1 = arith.constant 0 : i32
    return %c0_i32, %c0_i32_0 : i32, i32
  }
  func.func @transform_1(%arg0: i32) -> (i32, i32) {
    %c0_i32 = arith.constant 0 : i32
    %c0_i32_0 = arith.constant 0 : i32
    %c0_i32_1 = arith.constant 0 : i32
    return %c0_i32, %c0_i32_0 : i32, i32
  }
  func.func @transform_2(%arg0: i32) -> (i32, i32, i32) {
    %c0_i32 = arith.constant 0 : i32
    %c0_i32_0 = arith.constant 0 : i32
    %c0_i32_1 = arith.constant 0 : i32
    return %arg0, %c0_i32, %c0_i32_0 : i32, i32, i32
  }
  func.func @transform_3(%arg0: i32) -> (i32, i32, i32) {
    %c0_i32 = arith.constant 0 : i32
    %c0_i32_0 = arith.constant 0 : i32
    %c0_i32_1 = arith.constant 0 : i32
    return %arg0, %c0_i32, %c0_i32_0 : i32, i32, i32
  }
  func.func @transform_4(%arg0: i32) -> (i32, i32, i32) {
    %c0_i32 = arith.constant 0 : i32
    %c0_i32_0 = arith.constant 0 : i32
    %c0_i32_1 = arith.constant 0 : i32
    return %arg0, %c0_i32, %c0_i32_0 : i32, i32, i32
  }
  func.func @transform_5(%arg0: i32) -> (i32, i32, i32) {
    %c0_i32 = arith.constant 0 : i32
    %c0_i32_0 = arith.constant 0 : i32
    %c0_i32_1 = arith.constant 0 : i32
    return %arg0, %c0_i32, %c0_i32_0 : i32, i32, i32
  }
  func.func @transform_6(%arg0: i32) -> (i32, i32) {
    %c0_i32 = arith.constant 0 : i32
    %c0_i32_0 = arith.constant 0 : i32
    %c0_i32_1 = arith.constant 0 : i32
    return %c0_i32, %c0_i32_0 : i32, i32
  }
}

</mosaic_0001>

<bundles_post_ra>
// kernel: gnn_layer.1
= control target key start
LH: loop header
LB: loop body
LE: loop exit
PB: predicated region body
PF: predicated region fallthrough
CT: control target
= control target key end

     0   :  { %s1696_s21 = smov 0   ;;  %s2046_s0 = inlined_call_operand.vmem [shape: f32[16,128], index: 0, kind: input, shape index: {}]   ;;  %s2047_s1 = inlined_call_operand.vmem [shape: f32[16,128], index: 1, kind: input, shape index: {}]   ;;  %s2048_s2 = inlined_call_operand.vmem [shape: f32[4,128,128], index: 2, kind: input, shape index: {}]   ;;  %s2049_s3 = inlined_call_operand.vmem [shape: f32[4,128,1], index: 3, kind: input, shape index: {}]   ;;  %s2050_s4 = inlined_call_operand.vmem [shape: f32[4,128,1], index: 4, kind: input, shape index: {}]   ;;  %s2051_s5 = inlined_call_operand.vmem [shape: f32[4,128,128], index: 5, kind: input, shape index: {}]   ;;  %s2052_s6 = inlined_call_operand.vmem [shape: f32[16,128], index: 6, kind: output, shape index: {}]  }
   0x1 LB: > { %s1511_s22 = sadd.s32 4294967295, %s1656_s21   ;;  %p1514_p0 = scmp.ge.s32.totalorder %s1656_s21, 1  ;;  %s1656_s21 = sphi %s1696_s21, %s16_s21  }
   0x2   : > { %p237_p1 = scmp.lt.s32.totalorder %s1656_s21, 5 }
   0x4   : > { %p238_p2 = pnand %p1514_p0, %p237_p1 }
   0x5   : > { %p277_p3 = scmp.lt.s32.totalorder (!%p238_p2), %s1511_s22, 3  ;;  %p1523_p4 = scmp.ne.s32.totalorder (!%p238_p2), %s1511_s22, 0 }
   0x6   : > { %241 = sbr.rel (%p238_p2) target bundleno = 1916 (0x77c), region = 44 }
   0xb   : > { %v1707_v0 = vld [vmem:[%s2046_s0] sm:$0xff]  ;;  %v1712_v1 = vld [vmem:[%s2046_s0 + $0x8] sm:$0xff]  ;;  %s278_s7 = scalar_select %p277_p3, %s1511_s22, 3 }
   0xc   : > { %v1717_v2 = vld [vmem:[%s2047_s1] sm:$0xff]  ;;  %v1722_v3 = vld [vmem:[%s2047_s1 + $0x8] sm:$0xff]  ;;  %304 = sbr.rel (%p1523_p4) target bundleno = 435 (0x1b3), region = 48 }
   0xd   : > { %s1574_s8 = sshll.u32 %s278_s7, 7 }
   0xe   : > { %s1727_s11 = scalar_lea.vmem %s2048_s2, %s1574_s8  ;;  %s1732_s14 = scalar_lea.vmem %s2049_s3, %s1574_s8 }
   0xf   : > { %s1737_s17 = scalar_lea.vmem %s2050_s4, %s1574_s8  ;;  %s1742_s20 = scalar_lea.vmem %s2051_s5, %s1574_s8 }
  0x11   : > { %305 = vxpose.xlu0.b32.start [1/2] (short) %v1707_v0, 128  ;;  %400 = vmatpush.msra.mxu0 %v1722_v3  ;;  %v1658_v4 = vmov 0.0   ;;  %vm337_vm0 = vcmask 130048   ;;  %v467_v29 = vadd.f32 %v1722_v3, %v1717_v2 }
  0x12   : > { %492 = vst [vmem:[%s2052_s6] sm:$0xff] %v1658_v4  ;;  %1578 = vmatpush.msra.mxu1 %v1722_v3  ;;  %1579 = vmatpush.msra.mxu2 %v1722_v3 }
  0x13   : > { %493 = vst [vmem:[%s2052_s6 + $0x8] sm:$0xff] %v1658_v4  ;;  %401 = vmatpush.msra.mxu0 %v1717_v2  ;;  %1580 = vmatpush.msra.mxu3 %v1722_v3  ;;  %v468_v30 = vrot.slane %v467_v29, 4 }
  0x14   : > { %1581 = vmatpush.msra.mxu1 %v1717_v2  ;;  %1582 = vmatpush.msra.mxu2 %v1717_v2 }
  0x15   : > { %1583 = vmatpush.msra.mxu3 %v1717_v2  ;;  %v469_v31 = vadd.f32 %v468_v30, %v467_v29 }
  0x17   : > { %v470_v32 = vrot.slane %v469_v31, 2 }
  0x19   : > { %306 = vxpose.xlu0.b32.end [2/2] (short) %v1712_v1, 128  ;;  %v471_v34 = vadd.f32 %v470_v32, %v469_v31 }
  0x1b   : > { %v472_v35 = vrot.slane %v471_v34, 1 }
  0x1d   : > { %v473_v36 = vadd.f32 %v472_v35, %v471_v34 }
  0x1f   : > { %1601 = vrcp.f32 %v473_v36  ;;  %v486_v43 = vand.u32 2147483648, %v473_v36  ;;  %vm480_vm1 = vweird.f32 %v473_v36  ;;  %v484_v45 = vand.u32 2147483647, %v473_v36 }
  0x20   : > { %vm474_vm5 = vcmp.gt.f32.partialorder %v473_v36, 0.0 }
  0x21   : > { %v487_v46 = vor.u32 1.1754944e-38, %v486_v43  ;;  %vm485_vm4 = vcmp.eq.f32.partialorder %v484_v45, 8.507059e+37 }
  0x25   : > { %v1602_v38 = vpop.eup %1601 }
  0x26   : > { %v476_v39 = vmul.f32 %v1602_v38, %v473_v36  ;;  %vm481_vm2 = vweird.f32 %v1602_v38 }
  0x27   : > { %vm482_vm3 = vmor %vm480_vm1, %vm481_vm2 }
  0x28   : > { %v477_v41 = vsub.f32 1.0, %v476_v39 }
  0x2a   : > { %v478_v42 = vmul.f32 %v1602_v38, %v477_v41 }
  0x2c   : > { %v479_v44 = vadd.f32 %v1602_v38, %v478_v42 }
  0x2e   : > { %v483_v47 = vsel %vm482_vm3, %v1602_v38, %v479_v44 }
  0x2f   : > { %v488_v48 = vsel %vm485_vm4, %v487_v46, %v483_v47 }
  0x30   : > { %v490_v50 = vsel %vm474_vm5, %v488_v48, 0.0 }
  0x31   : > { %491 = vst [vmem:[#allocation3] sm:$0x1] %v490_v50 }
  0xb5   : > { %v321_v5 = vpop.trf.xlu0 }
  0xb6   : > { %1524 = vmatmul.msk.f32.vlgmr.msra.gmra.mxu0 %vm337_vm0, %v321_v5 }
  0xbd   : > { %v322_v6 = vpop.trf.xlu0 }
  0xbe   : > { %1525 = vmatmul.msk.f32.gmra.mxu0 %vm337_vm0, %v322_v6 }
  0xc5   : > { %v323_v7 = vpop.trf.xlu0 }
  0xc6   : > { %1526 = vmatmul.msk.f32.gmra.mxu0 %vm337_vm0, %v323_v7 }
  0xcd   : > { %v324_v8 = vpop.trf.xlu0 }
  0xce   : > { %1527 = vmatmul.msk.f32.gmra.mxu0 %vm337_vm0, %v324_v8 }
  0xd5   : > { %v325_v9 = vpop.trf.xlu0 }
  0xd6   : > { %1528 = vmatmul.msk.f32.vlgmr.msra.gmra.mxu1 %vm337_vm0, %v325_v9 }
  0xdd   : > { %v326_v10 = vpop.trf.xlu0 }
  0xde   : > { %1529 = vmatmul.msk.f32.gmra.mxu1 %vm337_vm0, %v326_v10 }
  0xe5   : > { %v327_v11 = vpop.trf.xlu0 }
  0xe6   : > { %1530 = vmatmul.msk.f32.gmra.mxu1 %vm337_vm0, %v327_v11 }
  0xed   : > { %v328_v12 = vpop.trf.xlu0 }
  0xee   : > { %1531 = vmatmul.msk.f32.gmra.mxu1 %vm337_vm0, %v328_v12 }
  0xf5   : > { %v329_v13 = vpop.trf.xlu0 }
  0xf6   : > { %1532 = vmatmul.msk.f32.vlgmr.msra.gmra.mxu2 %vm337_vm0, %v329_v13 }
  0xfd   : > { %v330_v14 = vpop.trf.xlu0 }
  0xfe   : > { %1533 = vmatmul.msk.f32.gmra.mxu2 %vm337_vm0, %v330_v14 }
 0x105   : > { %v331_v15 = vpop.trf.xlu0 }
 0x106   : > { %1534 = vmatmul.msk.f32.gmra.mxu2 %vm337_vm0, %v331_v15 }
 0x10d   : > { %v332_v16 = vpop.trf.xlu0 }
 0x10e   : > { %1535 = vmatmul.msk.f32.gmra.mxu2 %vm337_vm0, %v332_v16 }
 0x115   : > { %v333_v17 = vpop.trf.xlu0 }
 0x116   : > { %1536 = vmatmul.msk.f32.vlgmr.msra.gmra.mxu3 %vm337_vm0, %v333_v17 }
 0x11d   : > { %v334_v18 = vpop.trf.xlu0 }
 0x11e   : > { %1537 = vmatmul.msk.f32.gmra.mxu3 %vm337_vm0, %v334_v18 }
 0x125   : > { %v335_v19 = vpop.trf.xlu0 }
 0x126   : > { %1538 = vmatmul.msk.f32.gmra.mxu3 %vm337_vm0, %v335_v19 }
 0x12d   : > { %v336_v20 = vpop.trf.xlu0 }
 0x12e   : > { %1539 = vmatmul.msk.f32.gmra.mxu3 %vm337_vm0, %v336_v20 }
 0x133   : > { %v403_v21 = vpop.f32.mrf.mxu0 }
 0x134   : > { %451 = vst [vmem:[#allocation2 + $0x30] sm:$0xff] %v403_v21 }
 0x13b   : > { %v406_v22 = vpop.f32.mrf.mxu0 }
 0x13c   : > { %452 = vst [vmem:[#allocation2] sm:$0xff] %v406_v22 }
 0x143   : > { %v409_v23 = vpop.f32.mrf.mxu0 }
 0x144   : > { %453 = vst [vmem:[#allocation2 + $0x58] sm:$0xff] %v409_v23 }
 0x14b   : > { %v412_v24 = vpop.f32.mrf.mxu0 }
 0x14c   : > { %454 = vst [vmem:[#allocation2 + $0x18] sm:$0xff] %v412_v24 }
 0x153   : > { %v415_v25 = vpop.f32.mrf.mxu1 }
 0x154   : > { %455 = vst [vmem:[#allocation2 + $0x50] sm:$0xff] %v415_v25 }
 0x15b   : > { %v418_v26 = vpop.f32.mrf.mxu1 }
 0x15c   : > { %456 = vst [vmem:[#allocation2 + $0x68] sm:$0xff] %v418_v26 }
 0x163   : > { %v421_v27 = vpop.f32.mrf.mxu1 }
 0x164   : > { %457 = vst [vmem:[#allocation2 + $0x8] sm:$0xff] %v421_v27 }
 0x16b   : > { %v424_v28 = vpop.f32.mrf.mxu1 }
 0x16c   : > { %458 = vst [vmem:[#allocation2 + $0x48] sm:$0xff] %v424_v28 }
 0x179   : > { %v427_v33 = vpop.f32.mrf.mxu2 }
 0x17a   : > { %459 = vst [vmem:[#allocation2 + $0x40] sm:$0xff] %v427_v33 }
 0x181   : > { %v430_v37 = vpop.f32.mrf.mxu2 }
 0x182   : > { %460 = vst [vmem:[#allocation2 + $0x20] sm:$0xff] %v430_v37 }
 0x189   : > { %v433_v40 = vpop.f32.mrf.mxu2 }
 0x18a   : > { %461 = vst [vmem:[#allocation2 + $0x10] sm:$0xff] %v433_v40 }
 0x191   : > { %v436_v49 = vpop.f32.mrf.mxu2 }
 0x192   : > { %462 = vst [vmem:[#allocation2 + $0x38] sm:$0xff] %v436_v49 }
 0x199   : > { %v439_v51 = vpop.f32.mrf.mxu3 }
 0x19a   : > { %463 = vst [vmem:[#allocation2 + $0x60] sm:$0xff] %v439_v51 }
 0x1a1   : > { %v442_v52 = vpop.f32.mrf.mxu3 }
 0x1a2   : > { %464 = vst [vmem:[#allocation2 + $0x70] sm:$0xff] %v442_v52 }
 0x1a9   : > { %v445_v53 = vpop.f32.mrf.mxu3 }
 0x1aa   : > { %465 = vst [vmem:[#allocation2 + $0x78] sm:$0xff] %v445_v53 }
 0x1b1   : > { %v448_v54 = vpop.f32.mrf.mxu3 }
 0x1b2   : > { %466 = vst [vmem:[#allocation2 + $0x28] sm:$0xff] %v448_v54 }
 0x1b3 PF: > { %v541_v55 = vld [vmem:[%s1737_s17 + $0x78] sm:$0xff]  ;;  %v540_v56 = vld [vmem:[%s1737_s17 + $0x70] sm:$0xff]  ;;  %v539_v57 = vld [vmem:[%s1737_s17 + $0x68] sm:$0xff]  ;;  %vm842_vm2 = vcmask 130048  }
 0x1b4   : > { %604 = vmatpush.msra.mxu2 %v541_v55  ;;  %v538_v58 = vld [vmem:[%s1737_s17 + $0x60] sm:$0xff]  ;;  %v537_v59 = vld [vmem:[%s1737_s17 + $0x58] sm:$0xff]  ;;  %v536_v60 = vld [vmem:[%s1737_s17 + $0x50] sm:$0xff] }
 0x1b5   : > { %v535_v61 = vld [vmem:[%s1737_s17 + $0x48] sm:$0xff]  ;;  %v534_v62 = vld [vmem:[%s1737_s17 + $0x40] sm:$0xff]  ;;  %v533_v63 = vld [vmem:[%s1737_s17 + $0x38] sm:$0xff] }
 0x1b6   : > { %605 = vmatpush.msra.mxu2 %v540_v56  ;;  %v532_v4 = vld [vmem:[%s1737_s17 + $0x30] sm:$0xff]  ;;  %v531_v5 = vld [vmem:[%s1737_s17 + $0x28] sm:$0xff]  ;;  %v530_v6 = vld [vmem:[%s1737_s17 + $0x20] sm:$0xff] }
 0x1b7   : > { %v529_v7 = vld [vmem:[%s1737_s17 + $0x18] sm:$0xff]  ;;  %v528_v8 = vld [vmem:[%s1737_s17 + $0x10] sm:$0xff]  ;;  %v527_v11 = vld [vmem:[%s1737_s17 + $0x8] sm:$0xff] }
 0x1b8   : > { %606 = vmatpush.msra.mxu2 %v539_v57  ;;  %v509_v9 = vld [vmem:[%s1727_s11 + $0x78] sm:$0xff]  ;;  %v508_v10 = vld [vmem:[%s1727_s11 + $0x70] sm:$0xff]  ;;  %v507_v12 = vld [vmem:[%s1727_s11 + $0x68] sm:$0xff] }
 0x1b9   : > { %558 = vmatpush.msra.mxu1 %v509_v9  ;;  %v526_v13 = vld [vmem:[%s1737_s17] sm:$0xff]  ;;  %v505_v16 = vld [vmem:[%s1727_s11 + $0x58] sm:$0xff]  ;;  %v504_v17 = vld [vmem:[%s1727_s11 + $0x50] sm:$0xff] }
 0x1ba   : > { %607 = vmatpush.msra.mxu2 %v538_v58  ;;  %v506_v14 = vld [vmem:[%s1727_s11 + $0x60] sm:$0xff]  ;;  %v503_v18 = vld [vmem:[%s1727_s11 + $0x48] sm:$0xff]  ;;  %v501_v21 = vld [vmem:[%s1727_s11 + $0x38] sm:$0xff] }
 0x1bb   : > { %559 = vmatpush.msra.mxu1 %v508_v10  ;;  %v494_v15 = vld [vmem:[%s1727_s11] sm:$0xff]  ;;  %v495_v20 = vld [vmem:[%s1727_s11 + $0x8] sm:$0xff]  ;;  %v500_v22 = vld [vmem:[%s1727_s11 + $0x30] sm:$0xff] }
 0x1bc   : > { %608 = vmatpush.msra.mxu2 %v537_v59  ;;  %v502_v19 = vld [vmem:[%s1727_s11 + $0x40] sm:$0xff]  ;;  %v499_v23 = vld [vmem:[%s1727_s11 + $0x28] sm:$0xff]  ;;  %v496_v24 = vld [vmem:[%s1727_s11 + $0x10] sm:$0xff] }
 0x1bd   : > { %560 = vmatpush.msra.mxu1 %v507_v12  ;;  %v498_v25 = vld [vmem:[%s1727_s11 + $0x20] sm:$0xff]  ;;  %v497_v26 = vld [vmem:[%s1727_s11 + $0x18] sm:$0xff]  ;;  %v524_v28 = vld [vmem:[%s1732_s14 + $0x70] sm:$0xff] }
 0x1be   : > { %609 = vmatpush.msra.mxu2 %v536_v60  ;;  %v525_v27 = vld [vmem:[%s1732_s14 + $0x78] sm:$0xff]  ;;  %v684_v29 = vld [vmem:[#allocation2 + $0x28] sm:$0xff]  ;;  %v520_v32 = vld [vmem:[%s1732_s14 + $0x50] sm:$0xff] }
 0x1bf   : > { %561 = vmatpush.msra.mxu1 %v506_v14  ;;  %717 = vmatpush.msra.mxu3 %v684_v29  ;;  %v683_v30 = vld [vmem:[#allocation2 + $0x78] sm:$0xff]  ;;  %v682_v33 = vld [vmem:[#allocation2 + $0x70] sm:$0xff]  ;;  %v519_v35 = vld [vmem:[%s1732_s14 + $0x48] sm:$0xff] }
 0x1c0   : > { %610 = vmatpush.msra.mxu2 %v535_v61  ;;  %v521_v31 = vld [vmem:[%s1732_s14 + $0x58] sm:$0xff]  ;;  %v681_v36 = vld [vmem:[#allocation2 + $0x60] sm:$0xff]  ;;  %v679_v40 = vld [vmem:[#allocation2 + $0x10] sm:$0xff] }
 0x1c1   : > { %562 = vmatpush.msra.mxu1 %v505_v16  ;;  %718 = vmatpush.msra.mxu3 %v683_v30  ;;  %v518_v37 = vld [vmem:[%s1732_s14 + $0x40] sm:$0xff]  ;;  %v680_v38 = vld [vmem:[#allocation2 + $0x38] sm:$0xff]  ;;  %v516_v41 = vld [vmem:[%s1732_s14 + $0x30] sm:$0xff] }
 0x1c2   : > { %611 = vmatpush.msra.mxu2 %v534_v62  ;;  %v517_v39 = vld [vmem:[%s1732_s14 + $0x38] sm:$0xff]  ;;  %v678_v42 = vld [vmem:[#allocation2 + $0x20] sm:$0xff]  ;;  %v515_v44 = vld [vmem:[%s1732_s14 + $0x28] sm:$0xff] }
 0x1c3   : > { %563 = vmatpush.msra.mxu1 %v504_v17  ;;  %719 = vmatpush.msra.mxu3 %v682_v33  ;;  %v677_v45 = vld [vmem:[#allocation2 + $0x40] sm:$0xff]  ;;  %v676_v47 = vld [vmem:[#allocation2 + $0x48] sm:$0xff]  ;;  %v513_v48 = vld [vmem:[%s1732_s14 + $0x18] sm:$0xff] }
 0x1c4   : > { %612 = vmatpush.msra.mxu2 %v533_v63  ;;  %v514_v46 = vld [vmem:[%s1732_s14 + $0x20] sm:$0xff]  ;;  %v675_v49 = vld [vmem:[#allocation2 + $0x8] sm:$0xff]  ;;  %v512_v50 = vld [vmem:[%s1732_s14 + $0x10] sm:$0xff] }
 0x1c5   : > { %564 = vmatpush.msra.mxu1 %v503_v18  ;;  %720 = vmatpush.msra.mxu3 %v681_v36  ;;  %v674_v51 = vld [vmem:[#allocation2 + $0x68] sm:$0xff]  ;;  %v673_v54 = vld [vmem:[#allocation2 + $0x50] sm:$0xff]  ;;  %v510_v55 = vld [vmem:[%s1732_s14] sm:$0xff] }
 0x1c6   : > { %613 = vmatpush.msra.mxu2 %v532_v4  ;;  %v511_v53 = vld [vmem:[%s1732_s14 + $0x8] sm:$0xff]  ;;  %v672_v57 = vld [vmem:[#allocation2 + $0x18] sm:$0xff]  ;;  %v670_v59 = vld [vmem:[#allocation2] sm:$0xff] }
 0x1c7   : > { %565 = vmatpush.msra.mxu1 %v502_v19  ;;  %721 = vmatpush.msra.mxu3 %v680_v38  ;;  %v671_v58 = vld [vmem:[#allocation2 + $0x58] sm:$0xff]  ;;  %v669_v61 = vld [vmem:[#allocation2 + $0x30] sm:$0xff] }
 0x1c8   : > { %614 = vmatpush.msra.mxu2 %v531_v5 }
 0x1c9   : > { %566 = vmatpush.msra.mxu1 %v501_v21  ;;  %722 = vmatpush.msra.mxu3 %v679_v40 }
 0x1ca   : > { %615 = vmatpush.msra.mxu2 %v530_v6 }
 0x1cb   : > { %567 = vmatpush.msra.mxu1 %v500_v22  ;;  %723 = vmatpush.msra.mxu3 %v678_v42 }
 0x1cc   : > { %616 = vmatpush.msra.mxu2 %v529_v7 }
 0x1cd   : > { %568 = vmatpush.msra.mxu1 %v499_v23  ;;  %724 = vmatpush.msra.mxu3 %v677_v45 }
 0x1ce   : > { %617 = vmatpush.msra.mxu2 %v528_v8 }
 0x1cf   : > { %569 = vmatpush.msra.mxu1 %v498_v25  ;;  %725 = vmatpush.msra.mxu3 %v676_v47 }
 0x1d0   : > { %618 = vmatpush.msra.mxu2 %v527_v11 }
 0x1d1   : > { %570 = vmatpush.msra.mxu1 %v497_v26  ;;  %726 = vmatpush.msra.mxu3 %v675_v49 }
 0x1d2   : > { %619 = vmatpush.msra.mxu2 %v526_v13 }
 0x1d3   : > { %620 = vmatmul.f32.vlgmr.msra.gmra.mxu2 %v494_v15  ;;  %571 = vmatpush.msra.mxu1 %v496_v24 }
 0x1d4   : > { %727 = vmatpush.msra.mxu3 %v674_v51 }
 0x1d5   : > { %572 = vmatpush.msra.mxu1 %v495_v20 }
 0x1d6   : > { %728 = vmatpush.msra.mxu3 %v673_v54 }
 0x1d7   : > { %573 = vmatpush.msra.mxu1 %v494_v15  ;;  %v1659_v15 = vmov 0  }
 0x1d8   : > { %574 = vmatmul.f32.vlgmr.msra.gmra.mxu1 %v1707_v0  ;;  %v523_v0 = vld [vmem:[%s1732_s14 + $0x68] sm:$0xff]  ;;  %729 = vmatpush.msra.mxu3 %v672_v57 }
 0x1d9   : > { %581 = vmatpush.msrb.mxu1 %v525_v27  ;;  %1603 = vset.pattern.permute.xlu1 %v1659_v15 }
 0x1da   : > { %730 = vmatpush.msra.mxu3 %v671_v58  ;;  %1604 = vset.pattern.permute.xlu2 %v1659_v15 }
 0x1db   : > { %623 = vmatmul.f32.gmra.mxu2 %v495_v20  ;;  %582 = vmatpush.msrb.mxu1 %v524_v28  ;;  %v737_v20 = vld [vmem:[#allocation3] sm:$0x1] }
 0x1dc   : > { %731 = vmatpush.msra.mxu3 %v670_v59 }
 0x1dd   : > { %583 = vmatpush.msrb.mxu1 %v523_v0 }
 0x1de   : > { %732 = vmatpush.msra.mxu3 %v669_v61 }
 0x1e0   : > { %577 = vmatmul.f32.gmra.mxu1 %v1712_v1  ;;  %v522_v1 = vld [vmem:[%s1732_s14 + $0x60] sm:$0xff] }
 0x1e1   : > { %584 = vmatpush.msrb.mxu1 %v522_v1 }
 0x1e3   : > { %626 = vmatmul.f32.gmra.mxu2 %v496_v24  ;;  %585 = vmatpush.msrb.mxu1 %v521_v31 }
 0x1e5   : > { %586 = vmatpush.msrb.mxu1 %v520_v32 }
 0x1e7   : > { %587 = vmatpush.msrb.mxu1 %v519_v35 }
 0x1e9   : > { %588 = vmatpush.msrb.mxu1 %v518_v37 }
 0x1eb   : > { %629 = vmatmul.f32.gmra.mxu2 %v497_v26  ;;  %589 = vmatpush.msrb.mxu1 %v517_v39 }
 0x1ed   : > { %590 = vmatpush.msrb.mxu1 %v516_v41 }
 0x1ef   : > { %591 = vmatpush.msrb.mxu1 %v515_v44 }
 0x1f1   : > { %592 = vmatpush.msrb.mxu1 %v514_v46 }
 0x1f3   : > { %632 = vmatmul.f32.gmra.mxu2 %v498_v25  ;;  %593 = vmatpush.msrb.mxu1 %v513_v48 }
 0x1f5   : > { %594 = vmatpush.msrb.mxu1 %v512_v50 }
 0x1f7   : > { %595 = vmatpush.msrb.mxu1 %v511_v53 }
 0x1f9   : > { %596 = vmatpush.msrb.mxu1 %v510_v55 }
 0x1fb   : > { %635 = vmatmul.f32.gmra.mxu2 %v499_v23 }
 0x203   : > { %638 = vmatmul.f32.gmra.mxu2 %v500_v22 }
 0x20b   : > { %641 = vmatmul.f32.gmra.mxu2 %v501_v21 }
 0x213   : > { %644 = vmatmul.f32.gmra.mxu2 %v502_v19 }
 0x21b   : > { %647 = vmatmul.f32.gmra.mxu2 %v503_v18 }
 0x223   : > { %650 = vmatmul.f32.gmra.mxu2 %v504_v17 }
 0x22b   : > { %653 = vmatmul.f32.gmra.mxu2 %v505_v16 }
 0x233   : > { %656 = vmatmul.f32.gmra.mxu2 %v506_v14 }
 0x23b   : > { %659 = vmatmul.f32.gmra.mxu2 %v507_v12 }
 0x243   : > { %662 = vmatmul.f32.gmra.mxu2 %v508_v10 }
 0x24b   : > { %665 = vmatmul.f32.gmra.mxu2 %v509_v9 }
 0x255   : > { %v575_v56 = vpop.f32.mrf.mxu1 }
 0x256   : > { %v621_v34 = vpop.f32.mrf.mxu2  ;;  %597 = vmatmul.f32.vlgmr.msrb.gmra.mxu1 %v575_v56 }
 0x257   : > { %685 = vxpose.xlu0.b32.start [1/16] (narrow) %v621_v34, 8 }
 0x25d   : > { %v578_v62 = vpop.f32.mrf.mxu1 }
 0x25e   : > { %v624_v43 = vpop.f32.mrf.mxu2  ;;  %905 = vmatpush.msra.mxu0 %v578_v62  ;;  %1584 = vmatpush.msrb.mxu3 %v578_v62 }
 0x25f   : > { %686 = vxpose.xlu0.b32.cont [2/16] (narrow) %v624_v43, 8  ;;  %600 = vmatmul.f32.gmra.mxu1 %v578_v62 }
 0x260   : > { %906 = vmatpush.msra.mxu0 %v575_v56  ;;  %1585 = vmatpush.msrb.mxu3 %v575_v56 }
 0x266   : > { %v627_v52 = vpop.f32.mrf.mxu2 }
 0x267   : > { %687 = vxpose.xlu0.b32.cont [3/16] (narrow) %v627_v52, 8 }
 0x26e   : > { %v630_v60 = vpop.f32.mrf.mxu2 }
 0x26f   : > { %688 = vxpose.xlu0.b32.cont [4/16] (narrow) %v630_v60, 8 }
 0x276   : > { %v633_v63 = vpop.f32.mrf.mxu2 }
 0x277   : > { %689 = vxpose.xlu0.b32.cont [5/16] (narrow) %v633_v63, 8 }
 0x27e   : > { %v636_v4 = vpop.f32.mrf.mxu2 }
 0x27f   : > { %690 = vxpose.xlu0.b32.cont [6/16] (narrow) %v636_v4, 8 }
 0x286   : > { %v639_v5 = vpop.f32.mrf.mxu2 }
 0x287   : > { %691 = vxpose.xlu0.b32.cont [7/16] (narrow) %v639_v5, 8  ;;  %v1660_v5 = vmov 1.0  }
 0x288   : > { %970 = vmatpush.msrb.mxu0 %v1660_v5 }
 0x28a   : > { %971 = vmatpush.msrb.mxu0 %v1660_v5 }
 0x28e   : > { %v642_v6 = vpop.f32.mrf.mxu2 }
 0x28f   : > { %692 = vxpose.xlu0.b32.cont [8/16] (narrow) %v642_v6, 8 }
 0x296   : > { %v645_v7 = vpop.f32.mrf.mxu2 }
 0x297   : > { %693 = vxpose.xlu0.b32.cont [9/16] (narrow) %v645_v7, 8 }
 0x29e   : > { %v648_v8 = vpop.f32.mrf.mxu2 }
 0x29f   : > { %694 = vxpose.xlu0.b32.cont [10/16] (narrow) %v648_v8, 8 }
 0x2a6   : > { %v651_v9 = vpop.f32.mrf.mxu2 }
 0x2a7   : > { %695 = vxpose.xlu0.b32.cont [11/16] (narrow) %v651_v9, 8 }
 0x2ae   : > { %v654_v10 = vpop.f32.mrf.mxu2 }
 0x2af   : > { %696 = vxpose.xlu0.b32.cont [12/16] (narrow) %v654_v10, 8 }
 0x2b6   : > { %v657_v11 = vpop.f32.mrf.mxu2 }
 0x2b7   : > { %697 = vxpose.xlu0.b32.cont [13/16] (narrow) %v657_v11, 8 }
 0x2be   : > { %v660_v12 = vpop.f32.mrf.mxu2 }
 0x2bf   : > { %698 = vxpose.xlu0.b32.cont [14/16] (narrow) %v660_v12, 8 }
 0x2c6   : > { %v663_v13 = vpop.f32.mrf.mxu2 }
 0x2c7   : > { %699 = vxpose.xlu0.b32.cont [15/16] (narrow) %v663_v13, 8 }
 0x2ce   : > { %v666_v14 = vpop.f32.mrf.mxu2 }
 0x2cf   : > { %700 = vxpose.xlu0.b32.end [16/16] (narrow) %v666_v14, 8 }
 0x2d3   : > { %v598_v16 = vpop.f32.mrf.mxu1 }
 0x2d4   : > { %741 = vperm.xlu1 %1603, %v598_v16  }
 0x2dc   : > { %v601_v17 = vpop.f32.mrf.mxu1 }
 0x2dd   : > { %746 = vperm.xlu1 %1603, %v601_v17  }
 0x2fb   : > { %v701_v18 = vpop.trf.xlu0 }
 0x2fc   : > { %733 = vmatmul.f32.vlgmr.msra.gmra.mxu3 %v701_v18 }
 0x336   : > { %1605 = vset.pattern.permute.xlu0 %v1659_v15 }
 0x346   : > { %v742_v19 = vpop.permute.xlu1 %741 }
 0x34f   : > { %v747_v23 = vpop.permute.xlu1 %746 }
 0x37f   : > { %v734_v21 = vpop.f32.mrf.mxu3 }
 0x380   : > { %v738_v22 = vmul.f32 %v737_v20, %v734_v21 }
 0x382   : > { %v749_v24 = vperm.slane %v738_v22, 0 }
 0x384   : > { %v750_v25 = vadd.f32 %v749_v24, %v742_v19  ;;  %v751_v26 = vadd.f32 %v749_v24, %v747_v23 }
 0x386   : > { %v752_v27 = vmul.f32 0.125, %v750_v25  ;;  %v753_v28 = vmul.f32 0.125, %v751_v26 }
 0x388   : > { %1606 = vtanh.f32 %v752_v27 }
 0x389   : > { %1608 = vtanh.f32 %v753_v28 }
 0x38e   : > { %v1607_v0 = vpop.eup %1606 }
 0x38f   : > { %v1609_v1 = vpop.eup %1608  ;;  %v756_v29 = vmul.f32 8.0, %v1607_v0 }
 0x390   : > { %v757_v30 = vmul.f32 8.0, %v1609_v1 }
 0x391   : > { %vm758_vm6 = vcmp.ge.f32.partialorder %v756_v29, 0.0  ;;  %v760_v31 = vmul.f32 0.1, %v756_v29 }
 0x392   : > { %v761_v32 = vmul.f32 0.1, %v757_v30  ;;  %vm759_vm7 = vcmp.ge.f32.partialorder %v757_v30, 0.0 }
 0x393   : > { %v762_v33 = vsel %vm758_vm6, %v756_v29, %v760_v31 }
 0x394   : > { %v764_v34 = vmul.f32 1.442695, %v762_v33  ;;  %v763_v35 = vsel %vm759_vm7, %v757_v30, %v761_v32 }
 0x395   : > { %v766_v36 = vmul.f32 1.442695, %v763_v35 }
 0x396   : > { %1610 = vpow2.f32 %v764_v34 }
 0x397   : > { %1612 = vpow2.f32 %v766_v36 }
 0x39c   : > { %v1611_v37 = vpop.eup %1610 }
 0x39d   : > { %v768_v38 = vmul.f32 %v1611_v37, %v1717_v2  ;;  %v1613_v39 = vpop.eup %1612 }
 0x39e   : > { %v769_v40 = vmul.f32 %v1613_v39, %v1722_v3 }
 0x39f   : > { %770 = vadd.xlane.f32.xlu2 %v768_v38 }
 0x3a7   : > { %772 = vadd.xlane.f32.xlu2 %v769_v40 }
 0x412   : > { %v771_v41 = vpop.xlane.xlu2 %770 }
 0x413   : > { %1614 = vrcp.f32 %v771_v41  ;;  %v787_v46 = vand.u32 2147483648, %v771_v41  ;;  %v785_v48 = vand.u32 2147483647, %v771_v41  ;;  %vm781_vm9 = vweird.f32 %v771_v41 }
 0x414   : > { %vm774_vm12 = vcmp.gt.f32.partialorder %v771_v41, 0.0 }
 0x415   : > { %v788_v2 = vor.u32 1.1754944e-38, %v787_v46  ;;  %vm786_vm11 = vcmp.eq.f32.partialorder %v785_v48, 8.507059e+37 }
 0x419   : > { %v1615_v42 = vpop.eup %1614 }
 0x41a   : > { %v777_v43 = vmul.f32 %v1615_v42, %v771_v41  ;;  %v773_v44 = vpop.xlane.xlu2 %772  ;;  %vm782_vm8 = vweird.f32 %v1615_v42 }
 0x41b   : > { %1616 = vrcp.f32 %v773_v44  ;;  %vm783_vm10 = vmor %vm781_vm9, %vm782_vm8  ;;  %v802_v55 = vand.u32 2147483648, %v773_v44  ;;  %v800_v58 = vand.u32 2147483647, %v773_v44  ;;  %vm796_vm14 = vweird.f32 %v773_v44 }
 0x41c   : > { %v778_v45 = vsub.f32 1.0, %v777_v43  ;;  %vm775_vm1 = vcmp.gt.f32.partialorder %v773_v44, 0.0 }
 0x41d   : > { %v803_v60 = vor.u32 1.1754944e-38, %v802_v55  ;;  %vm801_vm0 = vcmp.eq.f32.partialorder %v800_v58, 8.507059e+37 }
 0x41e   : > { %v779_v47 = vmul.f32 %v1615_v42, %v778_v45 }
 0x420   : > { %v780_v49 = vadd.f32 %v1615_v42, %v779_v47 }
 0x421   : > { %v1617_v50 = vpop.eup %1616 }
 0x422   : > { %v792_v51 = vmul.f32 %v1617_v50, %v773_v44  ;;  %v784_v52 = vsel %vm783_vm10, %v1615_v42, %v780_v49  ;;  %vm797_vm13 = vweird.f32 %v1617_v50 }
 0x423   : > { %v789_v3 = vsel %vm786_vm11, %v788_v2, %v784_v52  ;;  %vm798_vm15 = vmor %vm796_vm14, %vm797_vm13 }
 0x424   : > { %v793_v53 = vsub.f32 1.0, %v792_v51  ;;  %v806_v54 = vsel %vm774_vm12, %v789_v3, 0.0 }
 0x425   : > { %v1830_v56 = vmul.f32 %v806_v54, %v768_v38 }
 0x426   : > { %v794_v57 = vmul.f32 %v1617_v50, %v793_v53 }
 0x427   : > { %810 = vxpose.xlu1.b32.start [1/2] (short) %v1830_v56, 128 }
 0x428   : > { %v795_v59 = vadd.f32 %v1617_v50, %v794_v57 }
 0x42a   : > { %v799_v61 = vsel %vm798_vm15, %v1617_v50, %v795_v59 }
 0x42b   : > { %v804_v62 = vsel %vm801_vm0, %v803_v60, %v799_v61 }
 0x42c   : > { %v807_v63 = vsel %vm775_vm1, %v804_v62, 0.0 }
 0x42d   : > { %v1833_v4 = vmul.f32 %v807_v63, %v769_v40 }
 0x42f   : > { %811 = vxpose.xlu1.b32.end [2/2] (short) %v1833_v4, 128 }
 0x4cb   : > { %v826_v6 = vpop.trf.xlu1 }
 0x4cc   : > { %1540 = vmatmul.msk.f32.vlgmr.msra.gmra.mxu0 %vm842_vm2, %v826_v6 }
 0x4d3   : > { %v827_v7 = vpop.trf.xlu1 }
 0x4d4   : > { %1541 = vmatmul.msk.f32.gmra.mxu0 %vm842_vm2, %v827_v7 }
 0x4db   : > { %v828_v8 = vpop.trf.xlu1 }
 0x4dc   : > { %1556 = vmatmul.msk.f32.vlgmr.msrb.gmra.mxu0 %vm842_vm2, %v826_v6  ;;  %1542 = vmatmul.msk.f32.vlgmr.msrb.gmra.mxu3 %vm842_vm2, %v828_v8 }
 0x4e3   : > { %v829_v9 = vpop.trf.xlu1 }
 0x4e4   : > { %1557 = vmatmul.msk.f32.gmra.mxu0 %vm842_vm2, %v827_v7  ;;  %1543 = vmatmul.msk.f32.gmra.mxu3 %vm842_vm2, %v829_v9 }
 0x4eb   : > { %v830_v10 = vpop.trf.xlu1 }
 0x4ec   : > { %1558 = vmatmul.msk.f32.gmra.mxu0 %vm842_vm2, %v828_v8  ;;  %1544 = vmatmul.msk.f32.gmra.mxu3 %vm842_vm2, %v830_v10 }
 0x4f3   : > { %v831_v11 = vpop.trf.xlu1 }
 0x4f4   : > { %1559 = vmatmul.msk.f32.gmra.mxu0 %vm842_vm2, %v829_v9  ;;  %1545 = vmatmul.msk.f32.gmra.mxu3 %vm842_vm2, %v831_v11 }
 0x4fb   : > { %v832_v12 = vpop.trf.xlu1 }
 0x4fc   : > { %1560 = vmatmul.msk.f32.gmra.mxu0 %vm842_vm2, %v830_v10  ;;  %1546 = vmatmul.msk.f32.gmra.mxu3 %vm842_vm2, %v832_v12 }
 0x503   : > { %v833_v13 = vpop.trf.xlu1 }
 0x504   : > { %1561 = vmatmul.msk.f32.gmra.mxu0 %vm842_vm2, %v831_v11  ;;  %1547 = vmatmul.msk.f32.gmra.mxu3 %vm842_vm2, %v833_v13 }
 0x50b   : > { %v834_v14 = vpop.trf.xlu1 }
 0x50c   : > { %1562 = vmatmul.msk.f32.gmra.mxu0 %vm842_vm2, %v832_v12  ;;  %1548 = vmatmul.msk.f32.gmra.mxu3 %vm842_vm2, %v834_v14 }
 0x513   : > { %v835_v15 = vpop.trf.xlu1 }
 0x514   : > { %1563 = vmatmul.msk.f32.gmra.mxu0 %vm842_vm2, %v833_v13  ;;  %1549 = vmatmul.msk.f32.gmra.mxu3 %vm842_vm2, %v835_v15 }
 0x51b   : > { %v836_v16 = vpop.trf.xlu1 }
 0x51c   : > { %1564 = vmatmul.msk.f32.gmra.mxu0 %vm842_vm2, %v834_v14  ;;  %1550 = vmatmul.msk.f32.gmra.mxu3 %vm842_vm2, %v836_v16 }
 0x523   : > { %v837_v17 = vpop.trf.xlu1 }
 0x524   : > { %1565 = vmatmul.msk.f32.gmra.mxu0 %vm842_vm2, %v835_v15  ;;  %1551 = vmatmul.msk.f32.gmra.mxu3 %vm842_vm2, %v837_v17 }
 0x52b   : > { %v838_v18 = vpop.trf.xlu1 }
 0x52c   : > { %1566 = vmatmul.msk.f32.gmra.mxu0 %vm842_vm2, %v836_v16  ;;  %1552 = vmatmul.msk.f32.gmra.mxu3 %vm842_vm2, %v838_v18 }
 0x533   : > { %v839_v19 = vpop.trf.xlu1 }
 0x534   : > { %1567 = vmatmul.msk.f32.gmra.mxu0 %vm842_vm2, %v837_v17  ;;  %1553 = vmatmul.msk.f32.gmra.mxu3 %vm842_vm2, %v839_v19 }
 0x53b   : > { %v840_v20 = vpop.trf.xlu1 }
 0x53c   : > { %1568 = vmatmul.msk.f32.gmra.mxu0 %vm842_vm2, %v838_v18  ;;  %1554 = vmatmul.msk.f32.gmra.mxu3 %vm842_vm2, %v840_v20 }
 0x543   : > { %v841_v21 = vpop.trf.xlu1 }
 0x544   : > { %1569 = vmatmul.msk.f32.gmra.mxu0 %vm842_vm2, %v839_v19  ;;  %1555 = vmatmul.msk.f32.gmra.mxu3 %vm842_vm2, %v841_v21 }
 0x549   : > { %v1866_v22 = vpop.f32.mrf.mxu0 }
 0x54c   : > { %1570 = vmatmul.msk.f32.gmra.mxu0 %vm842_vm2, %v840_v20 }
 0x551   : > { %v1869_v23 = vpop.f32.mrf.mxu0 }
 0x554   : > { %1571 = vmatmul.msk.f32.gmra.mxu0 %vm842_vm2, %v841_v21 }
 0x559   : > { %v1872_v24 = vpop.f32.mrf.mxu0 }
 0x561   : > { %v1874_v25 = vpop.f32.mrf.mxu0 }
 0x569   : > { %v979_v26 = vpop.f32.mrf.mxu0 }
 0x56a   : > { %1618 = vrcp.f32 %v979_v26  ;;  %v1078_v29 = vand.u32 2147483648, %v979_v26  ;;  %v1076_v31 = vand.u32 2147483647, %v979_v26  ;;  %vm1072_vm4 = vweird.f32 %v979_v26 }
 0x56b   : > { %vm1023_vm7 = vcmp.gt.f32.partialorder %v979_v26, 0.0 }
 0x56c   : > { %v1079_v33 = vor.u32 1.1754944e-38, %v1078_v29  ;;  %vm1077_vm6 = vcmp.eq.f32.partialorder %v1076_v31, 8.507059e+37 }
 0x570   : > { %v1619_v27 = vpop.eup %1618 }
 0x571   : > { %v1068_v28 = vmul.f32 %v1619_v27, %v979_v26  ;;  %v1876_v0 = vpop.f32.mrf.mxu0  ;;  %vm1073_vm3 = vweird.f32 %v1619_v27 }
 0x572   : > { %vm1074_vm5 = vmor %vm1072_vm4, %vm1073_vm3 }
 0x573   : > { %v1069_v1 = vsub.f32 1.0, %v1068_v28 }
 0x575   : > { %v1070_v30 = vmul.f32 %v1619_v27, %v1069_v1 }
 0x577   : > { %v1071_v32 = vadd.f32 %v1619_v27, %v1070_v30 }
 0x579   : > { %v1878_v34 = vpop.f32.mrf.mxu0  ;;  %v1075_v35 = vsel %vm1074_vm5, %v1619_v27, %v1071_v32 }
 0x57a   : > { %v1080_v36 = vsel %vm1077_vm6, %v1079_v33, %v1075_v35 }
 0x57b   : > { %v1279_v37 = vsel %vm1023_vm7, %v1080_v36, 0.0 }
 0x57c   : > { %1305 = vperm.xlu0 %1605, %v1279_v37  }
 0x581   : > { %v1880_v38 = vpop.f32.mrf.mxu0 }
 0x589   : > { %v1882_v39 = vpop.f32.mrf.mxu0 }
 0x58a   : > { %v1138_v1 = vand.u32 2147483648, %v1882_v39  ;;  %v1136_v31 = vand.u32 2147483647, %v1882_v39 }
 0x58c   : > { %v1139_v36 = vor.u32 1.1754944e-38, %v1138_v1 }
 0x591   : > { %v1884_v40 = vpop.f32.mrf.mxu0 }
 0x592   : > { %1620 = vrcp.f32 %v1884_v40  ;;  %vm1147_vm10 = vweird.f32 %v1884_v40  ;;  %v1151_v54 = vand.u32 2147483647, %v1884_v40  ;;  %v1153_v59 = vand.u32 2147483648, %v1884_v40 }
 0x593   : > { %vm1028_vm7 = vcmp.gt.f32.partialorder %v1884_v40, 0.0 }
 0x594   : > { %v1154_v15 = vor.u32 1.1754944e-38, %v1153_v59  ;;  %vm1152_vm3 = vcmp.eq.f32.partialorder %v1151_v54, 8.507059e+37 }
 0x598   : > { %v1621_v42 = vpop.eup %1620 }
 0x599   : > { %v997_v41 = vpop.f32.mrf.mxu0  ;;  %v1143_v43 = vmul.f32 %v1621_v42, %v1884_v40  ;;  %vm1148_vm12 = vweird.f32 %v1621_v42 }
 0x59a   : > { %1622 = vrcp.f32 %v997_v41  ;;  %v1168_v2 = vand.u32 2147483648, %v997_v41  ;;  %v1166_v52 = vand.u32 2147483647, %v997_v41  ;;  %vm1162_vm9 = vweird.f32 %v997_v41  ;;  %vm1149_vm1 = vmor %vm1147_vm10, %vm1148_vm12 }
 0x59b   : > { %1624 = vrcp.f32 %v1882_v39  ;;  %v1144_v46 = vsub.f32 1.0, %v1143_v43  ;;  %vm1029_vm14 = vcmp.gt.f32.partialorder %v997_v41, 0.0  ;;  %vm1137_vm10 = vcmp.eq.f32.partialorder %v1136_v31, 8.507059e+37 }
 0x59c   : > { %v1169_v58 = vor.u32 1.1754944e-38, %v1168_v2  ;;  %vm1167_vm13 = vcmp.eq.f32.partialorder %v1166_v52, 8.507059e+37  ;;  %vm1027_vm12 = vcmp.gt.f32.partialorder %v1882_v39, 0.0 }
 0x59d   : > { %v1145_v3 = vmul.f32 %v1621_v42, %v1144_v46 }
 0x59f   : > { %v1146_v63 = vadd.f32 %v1621_v42, %v1145_v3 }
 0x5a0   : > { %v1623_v44 = vpop.eup %1622 }
 0x5a1   : > { %v1889_v45 = vpop.eup %1624  ;;  %v1158_v47 = vmul.f32 %v1623_v44, %v997_v41  ;;  %v1000_v48 = vpop.f32.mrf.mxu0  ;;  %vm1163_vm8 = vweird.f32 %v1623_v44  ;;  %v1150_v12 = vsel %vm1149_vm1, %v1621_v42, %v1146_v63 }
 0x5a2   : > { %1626 = vrcp.f32 %v1000_v48  ;;  %v1128_v50 = vmul.f32 %v1889_v45, %v1882_v39  ;;  %vm1164_vm11 = vmor %vm1162_vm9, %vm1163_vm8  ;;  %vm1177_vm15 = vweird.f32 %v1000_v48  ;;  %v1183_v7 = vand.u32 2147483648, %v1000_v48 }
 0x5a3   : > { %v1159_v49 = vsub.f32 1.0, %v1158_v47  ;;  %1628 = vrcp.f32 %v1880_v38  ;;  %v1181_v10 = vand.u32 2147483647, %v1000_v48  ;;  %v1155_v18 = vsel %vm1152_vm3, %v1154_v15, %v1150_v12 }
 0x5a4   : > { %v1129_v57 = vsub.f32 1.0, %v1128_v50  ;;  %v1184_v16 = vor.u32 1.1754944e-38, %v1183_v7  ;;  %vm1030_vm5 = vcmp.gt.f32.partialorder %v1000_v48, 0.0  ;;  %vm1133_vm6 = vweird.f32 %v1889_v45 }
 0x5a5   : > { %v1160_v51 = vmul.f32 %v1623_v44, %v1159_v49  ;;  %vm1182_vm4 = vcmp.eq.f32.partialorder %v1181_v10, 8.507059e+37  ;;  %v1284_v29 = vsel %vm1028_vm7, %v1155_v18, 0.0  ;;  %vm1132_vm8 = vweird.f32 %v1882_v39 }
 0x5a6   : > { %v1130_v14 = vmul.f32 %v1889_v45, %v1129_v57  ;;  %vm1134_vm9 = vmor %vm1132_vm8, %vm1133_vm6 }
 0x5a7   : > { %v1161_v53 = vadd.f32 %v1623_v44, %v1160_v51 }
 0x5a8   : > { %v1627_v55 = vpop.eup %1626  ;;  %v1131_v26 = vadd.f32 %v1889_v45, %v1130_v14 }
 0x5a9   : > { %v1173_v60 = vmul.f32 %v1627_v55, %v1000_v48  ;;  %v1897_v61 = vpop.f32.mrf.mxu0  ;;  %v1165_v62 = vsel %vm1164_vm11, %v1623_v44, %v1161_v53  ;;  %v1899_v5 = vpop.eup %1628  ;;  %vm1178_vm0 = vweird.f32 %v1627_v55  ;;  %v1123_v44 = vand.u32 2147483648, %v1880_v38 }
 0x5aa   : > { %v1170_v6 = vsel %vm1167_vm13, %v1169_v58, %v1165_v62  ;;  %1630 = vrcp.f32 %v1897_v61  ;;  %v1113_v11 = vmul.f32 %v1899_v5, %v1880_v38  ;;  %vm1179_vm2 = vmor %vm1177_vm15, %vm1178_vm0  ;;  %v1135_v33 = vsel %vm1134_vm9, %v1889_v45, %v1131_v26 }
 0x5ab   : > { %v1174_v8 = vsub.f32 1.0, %v1173_v60  ;;  %v1285_v9 = vsel %vm1029_vm14, %v1170_v6, 0.0  ;;  %v1140_v37 = vsel %vm1137_vm10, %v1139_v36, %v1135_v33  ;;  %vm1118_vm11 = vweird.f32 %v1899_v5 }
 0x5ac   : > { %1335 = vperm.xlu2 %1604, %v1285_v9   ;;  %v1114_v19 = vsub.f32 1.0, %v1113_v11  ;;  %v1283_v46 = vsel %vm1027_vm12, %v1140_v37, 0.0  ;;  %vm1117_vm13 = vweird.f32 %v1880_v38  ;;  %v1121_v45 = vand.u32 2147483647, %v1880_v38  ;;  %v1945_v9 = vpop.f32.mrf.mxu3 }
 0x5ad   : > { %v1175_v13 = vmul.f32 %v1627_v55, %v1174_v8  ;;  %vm1119_vm14 = vmor %vm1117_vm13, %vm1118_vm11  ;;  %v1124_v50 = vor.u32 1.1754944e-38, %v1123_v44  ;;  %vm1192_vm0 = vweird.f32 %v1897_v61  ;;  %v1198_v2 = vand.u32 2147483648, %v1897_v61 }
 0x5ae   : > { %v1115_v35 = vmul.f32 %v1899_v5, %v1114_v19  ;;  %vm1122_vm15 = vcmp.eq.f32.partialorder %v1121_v45, 8.507059e+37  ;;  %v1196_v53 = vand.u32 2147483647, %v1897_v61  ;;  %vm1031_vm7 = vcmp.gt.f32.partialorder %v1897_v61, 0.0 }
 0x5af   : > { %v1176_v17 = vadd.f32 %v1627_v55, %v1175_v13  ;;  %v1199_v57 = vor.u32 1.1754944e-38, %v1198_v2 }
 0x5b0   : > { %v1631_v27 = vpop.eup %1630  ;;  %v1116_v42 = vadd.f32 %v1899_v5, %v1115_v35 }
 0x5b1   : > { %v1908_v20 = vpop.f32.mrf.mxu0  ;;  %v1180_v21 = vsel %vm1179_vm2, %v1627_v55, %v1176_v17  ;;  %v1188_v32 = vmul.f32 %v1631_v27, %v1897_v61  ;;  %vm1193_vm1 = vweird.f32 %v1631_v27  ;;  %vm1026_vm2 = vcmp.gt.f32.partialorder %v1880_v38, 0.0 }
 0x5b2   : > { %v1185_v28 = vsel %vm1182_vm4, %v1184_v16, %v1180_v21  ;;  %1632 = vrcp.f32 %v1908_v20  ;;  %v1120_v48 = vsel %vm1119_vm14, %v1899_v5, %v1116_v42  ;;  %vm1194_vm3 = vmor %vm1192_vm0, %vm1193_vm1  ;;  %vm1197_vm4 = vcmp.eq.f32.partialorder %v1196_v53, 8.507059e+37 }
 0x5b3   : > { %v1286_v30 = vsel %vm1030_vm5, %v1185_v28, 0.0  ;;  %v1189_v40 = vsub.f32 1.0, %v1188_v32  ;;  %v1125_v39 = vsel %vm1122_vm15, %v1124_v50, %v1120_v48  ;;  %vm1207_vm5 = vweird.f32 %v1908_v20 }
 0x5b4   : > { %1330 = vperm.xlu2 %1604, %v1284_v29   ;;  %1340 = vperm.xlu1 %1603, %v1286_v30   ;;  %v1282_v55 = vsel %vm1026_vm2, %v1125_v39, 0.0  ;;  %v1213_v63 = vand.u32 2147483648, %v1908_v20  ;;  %v1211_v7 = vand.u32 2147483647, %v1908_v20  ;;  %vm1032_vm12 = vcmp.gt.f32.partialorder %v1908_v20, 0.0 }
 0x5b5   : > { %v1190_v49 = vmul.f32 %v1631_v27, %v1189_v40 }
 0x5b6   : > { %v1214_v11 = vor.u32 1.1754944e-38, %v1213_v63  ;;  %vm1212_vm9 = vcmp.eq.f32.partialorder %v1211_v7, 8.507059e+37 }
 0x5b7   : > { %v1191_v3 = vadd.f32 %v1631_v27, %v1190_v49 }
 0x5b8   : > { %v1633_v43 = vpop.eup %1632 }
 0x5b9   : > { %v1920_v41 = vpop.f32.mrf.mxu0  ;;  %v1203_v47 = vmul.f32 %v1633_v43, %v1908_v20  ;;  %v1195_v59 = vsel %vm1194_vm3, %v1631_v27, %v1191_v3  ;;  %vm1208_vm6 = vweird.f32 %v1633_v43  ;;  %v1955_v27 = vpop.f32.mrf.mxu3 }
 0x5ba   : > { %1634 = vrcp.f32 %v1920_v41  ;;  %v1200_v62 = vsel %vm1197_vm4, %v1199_v57, %v1195_v59  ;;  %vm1209_vm8 = vmor %vm1207_vm5, %vm1208_vm6  ;;  %vm1222_vm10 = vweird.f32 %v1920_v41  ;;  %v1228_v15 = vand.u32 2147483648, %v1920_v41 }
 0x5bb   : > { %v1204_v51 = vsub.f32 1.0, %v1203_v47  ;;  %v1287_v10 = vsel %vm1031_vm7, %v1200_v62, 0.0  ;;  %v1226_v19 = vand.u32 2147483647, %v1920_v41  ;;  %vm1033_vm1 = vcmp.gt.f32.partialorder %v1920_v41, 0.0 }
 0x5bc   : > { %1325 = vperm.xlu2 %1604, %v1283_v46   ;;  %v1229_v28 = vor.u32 1.1754944e-38, %v1228_v15 }
 0x5bd   : > { %v1205_v60 = vmul.f32 %v1633_v43, %v1204_v51  ;;  %vm1227_vm14 = vcmp.eq.f32.partialorder %v1226_v19, 8.507059e+37 }
 0x5bf   : > { %v1206_v6 = vadd.f32 %v1633_v43, %v1205_v60 }
 0x5c0   : > { %v1635_v54 = vpop.eup %1634 }
 0x5c1   : > { %v1933_v52 = vpop.f32.mrf.mxu0  ;;  %v1218_v58 = vmul.f32 %v1635_v54, %v1920_v41  ;;  %v1210_v12 = vsel %vm1209_vm8, %v1633_v43, %v1206_v6  ;;  %vm1223_vm11 = vweird.f32 %v1635_v54  ;;  %v1965_v41 = vpop.f32.mrf.mxu3 }
 0x5c2   : > { %1636 = vrcp.f32 %v1933_v52  ;;  %v1215_v14 = vsel %vm1212_vm9, %v1214_v11, %v1210_v12  ;;  %vm1224_vm13 = vmor %vm1222_vm10, %vm1223_vm11  ;;  %vm1237_vm15 = vweird.f32 %v1933_v52  ;;  %v1243_v31 = vand.u32 2147483648, %v1933_v52 }
 0x5c3   : > { %v1219_v38 = vsub.f32 1.0, %v1218_v58  ;;  %v1288_v26 = vsel %vm1032_vm12, %v1215_v14, 0.0  ;;  %v1241_v35 = vand.u32 2147483647, %v1933_v52  ;;  %vm1034_vm6 = vcmp.gt.f32.partialorder %v1933_v52, 0.0 }
 0x5c4   : > { %1320 = vperm.xlu2 %1604, %v1282_v55   ;;  %v1244_v40 = vor.u32 1.1754944e-38, %v1243_v31  ;;  %v1108_v12 = vand.u32 2147483648, %v1878_v34  ;;  %v1106_v14 = vand.u32 2147483647, %v1878_v34 }
 0x5c5   : > { %v1220_v13 = vmul.f32 %v1635_v54, %v1219_v38  ;;  %vm1242_vm3 = vcmp.eq.f32.partialorder %v1241_v35, 8.507059e+37 }
 0x5c7   : > { %v1221_v18 = vadd.f32 %v1635_v54, %v1220_v13 }
 0x5c8   : > { %v1637_v8 = vpop.eup %1636 }
 0x5c9   : > { %v1942_v5 = vpop.f32.mrf.mxu0  ;;  %v1233_v61 = vmul.f32 %v1637_v8, %v1933_v52  ;;  %v1225_v1 = vsel %vm1224_vm13, %v1635_v54, %v1221_v18  ;;  %vm1238_vm0 = vweird.f32 %v1637_v8  ;;  %v1974_v52 = vpop.f32.mrf.mxu3  ;;  %v1109_v18 = vor.u32 1.1754944e-38, %v1108_v12 }
 0x5ca   : > { %1638 = vrcp.f32 %v1942_v5  ;;  %v1230_v30 = vsel %vm1227_vm14, %v1229_v28, %v1225_v1  ;;  %vm1239_vm2 = vmor %vm1237_vm15, %vm1238_vm0  ;;  %vm1252_vm4 = vweird.f32 %v1942_v5  ;;  %v1258_v45 = vand.u32 2147483648, %v1942_v5 }
 0x5cb   : > { %v1234_v16 = vsub.f32 1.0, %v1233_v61  ;;  %v1289_v37 = vsel %vm1033_vm1, %v1230_v30, 0.0  ;;  %v1256_v49 = vand.u32 2147483647, %v1942_v5  ;;  %vm1035_vm11 = vcmp.gt.f32.partialorder %v1942_v5, 0.0 }
 0x5cc   : > { %1345 = vperm.xlu2 %1604, %v1287_v10   ;;  %v1259_v2 = vor.u32 1.1754944e-38, %v1258_v45  ;;  %vm1102_vm0 = vweird.f32 %v1878_v34 }
 0x5cd   : > { %v1235_v29 = vmul.f32 %v1637_v8, %v1234_v16  ;;  %vm1257_vm8 = vcmp.eq.f32.partialorder %v1256_v49, 8.507059e+37 }
 0x5cf   : > { %v1236_v33 = vadd.f32 %v1637_v8, %v1235_v29  ;;  %v1091_v29 = vand.u32 2147483647, %v1876_v0 }
 0x5d0   : > { %v1639_v21 = vpop.eup %1638 }
 0x5d1   : > { %v1952_v17 = vpop.f32.mrf.mxu0  ;;  %v1248_v20 = vmul.f32 %v1639_v21, %v1942_v5  ;;  %v1240_v43 = vsel %vm1239_vm2, %v1637_v8, %v1236_v33  ;;  %vm1253_vm5 = vweird.f32 %v1639_v21  ;;  %v1982_v61 = vpop.f32.mrf.mxu3  ;;  %vm1107_vm2 = vcmp.eq.f32.partialorder %v1106_v14, 8.507059e+37 }
 0x5d2   : > { %1640 = vrcp.f32 %v1952_v17  ;;  %v1245_v46 = vsel %vm1242_vm3, %v1244_v40, %v1240_v43  ;;  %vm1254_vm7 = vmor %vm1252_vm4, %vm1253_vm5  ;;  %vm1267_vm9 = vweird.f32 %v1952_v17  ;;  %v1273_v55 = vand.u32 2147483648, %v1952_v17 }
 0x5d3   : > { %v1249_v32 = vsub.f32 1.0, %v1248_v20  ;;  %1642 = vrcp.f32 %v1878_v34  ;;  %v1290_v39 = vsel %vm1034_vm6, %v1245_v46, 0.0  ;;  %v1271_v59 = vand.u32 2147483647, %v1952_v17 }
 0x5d4   : > { %1350 = vperm.xlu2 %1604, %v1288_v26   ;;  %1644 = vrcp.f32 %v1876_v0  ;;  %v1274_v63 = vor.u32 1.1754944e-38, %v1273_v55  ;;  %vm1036_vm14 = vcmp.gt.f32.partialorder %v1952_v17, 0.0  ;;  %vm1025_vm4 = vcmp.gt.f32.partialorder %v1878_v34, 0.0 }
 0x5d5   : > { %v1250_v44 = vmul.f32 %v1639_v21, %v1249_v32  ;;  %1646 = vrcp.f32 %v1874_v25  ;;  %vm1272_vm13 = vcmp.eq.f32.partialorder %v1271_v59, 8.507059e+37  ;;  %v1093_v20 = vand.u32 2147483648, %v1876_v0 }
 0x5d6   : > { %1648 = vrcp.f32 %v1872_v24  ;;  %vm1087_vm5 = vweird.f32 %v1876_v0  ;;  %v1063_v40 = vand.u32 2147483648, %v1874_v25  ;;  %v1061_v43 = vand.u32 2147483647, %v1874_v25 }
 0x5d7   : > { %v1251_v48 = vadd.f32 %v1639_v21, %v1250_v44  ;;  %v1094_v35 = vor.u32 1.1754944e-38, %v1093_v20 }
 0x5d8   : > { %v1641_v36 = vpop.eup %1640 }
 0x5d9   : > { %v1263_v42 = vmul.f32 %v1641_v36, %v1952_v17  ;;  %v1643_v50 = vpop.eup %1642  ;;  %v1255_v53 = vsel %vm1254_vm7, %v1639_v21, %v1251_v48  ;;  %vm1268_vm10 = vweird.f32 %v1641_v36  ;;  %v1993_v30 = vpop.f32.mrf.mxu3  ;;  %vm1092_vm7 = vcmp.eq.f32.partialorder %v1091_v29, 8.507059e+37 }
 0x5da   : > { %v1098_v51 = vmul.f32 %v1643_v50, %v1878_v34  ;;  %v1260_v54 = vsel %vm1257_vm8, %v1259_v2, %v1255_v53  ;;  %v1645_v60 = vpop.eup %1644  ;;  %vm1269_vm12 = vmor %vm1267_vm9, %vm1268_vm10  ;;  %vm1103_vm15 = vweird.f32 %v1643_v50  ;;  %vm1024_vm9 = vcmp.gt.f32.partialorder %v1876_v0, 0.0 }
 0x5db   : > { %v1264_v47 = vsub.f32 1.0, %v1263_v42  ;;  %v1291_v62 = vsel %vm1035_vm11, %v1260_v54, 0.0  ;;  %v1083_v38 = vmul.f32 %v1645_v60, %v1876_v0  ;;  %v1647_v11 = vpop.eup %1646  ;;  %vm1104_vm1 = vmor %vm1102_vm0, %vm1103_vm15  ;;  %vm1088_vm3 = vweird.f32 %v1645_v60 }
 0x5dc   : > { %1355 = vperm.xlu2 %1604, %v1289_v37   ;;  %v1099_v57 = vsub.f32 1.0, %v1098_v51  ;;  %v1053_v15 = vmul.f32 %v1647_v11, %v1874_v25  ;;  %v1649_v28 = vpop.eup %1648  ;;  %vm1089_vm6 = vmor %vm1087_vm5, %vm1088_vm3  ;;  %vm1058_vm8 = vweird.f32 %v1647_v11  ;;  %vm1057_vm10 = vweird.f32 %v1874_v25 }
 0x5dd   : > { %v1265_v3 = vmul.f32 %v1641_v36, %v1264_v47  ;;  %v1084_v8 = vsub.f32 1.0, %v1083_v38  ;;  %v1038_v31 = vmul.f32 %v1649_v28, %v1872_v24  ;;  %vm1059_vm11 = vmor %vm1057_vm10, %vm1058_vm8  ;;  %v1064_v48 = vor.u32 1.1754944e-38, %v1063_v40  ;;  %v549_v40 = vld [vmem:[%s1742_s20 + $0x38] sm:$0xff] }
 0x5de   : > { %v1100_v7 = vmul.f32 %v1643_v50, %v1099_v57  ;;  %v1054_v21 = vsub.f32 1.0, %v1053_v15  ;;  %v1048_v0 = vand.u32 2147483648, %v1872_v24  ;;  %vm1042_vm15 = vweird.f32 %v1872_v24 }
 0x5df   : > { %v1266_v58 = vadd.f32 %v1641_v36, %v1265_v3  ;;  %v1085_v17 = vmul.f32 %v1645_v60, %v1084_v8  ;;  %v1039_v37 = vsub.f32 1.0, %v1038_v31  ;;  %v1046_v51 = vand.u32 2147483647, %v1872_v24 }
 0x5e0   : > { %v1101_v10 = vadd.f32 %v1643_v50, %v1100_v7  ;;  %v1055_v33 = vmul.f32 %v1647_v11, %v1054_v21  ;;  %v1049_v54 = vor.u32 1.1754944e-38, %v1048_v0 }
 0x5e1   : > { %v1270_v6 = vsel %vm1269_vm12, %v1641_v36, %v1266_v58  ;;  %v1086_v26 = vadd.f32 %v1645_v60, %v1085_v17  ;;  %v1040_v46 = vmul.f32 %v1649_v28, %v1039_v37  ;;  %v932_v45 = vpop.f32.mrf.mxu3  ;;  %vm1062_vm12 = vcmp.eq.f32.partialorder %v1061_v43, 8.507059e+37  ;;  %v553_v37 = vld [vmem:[%s1742_s20 + $0x58] sm:$0xff]  ;;  %v547_v43 = vld [vmem:[%s1742_s20 + $0x28] sm:$0xff] }
 0x5e2   : > { %v1275_v5 = vsel %vm1272_vm13, %v1274_v63, %v1270_v6  ;;  %v1105_v16 = vsel %vm1104_vm1, %v1643_v50, %v1101_v10  ;;  %v1056_v34 = vadd.f32 %v1647_v11, %v1055_v33  ;;  %vm1043_vm13 = vweird.f32 %v1649_v28 }
 0x5e3   : > { %v1292_v13 = vsel %vm1036_vm14, %v1275_v5, 0.0  ;;  %v1110_v19 = vsel %vm1107_vm2, %v1109_v18, %v1105_v16  ;;  %v1090_v32 = vsel %vm1089_vm6, %v1645_v60, %v1086_v26  ;;  %vm1022_vm14 = vcmp.gt.f32.partialorder %v1874_v25, 0.0  ;;  %vm1044_vm0 = vmor %vm1042_vm15, %vm1043_vm13 }
 0x5e4   : > { %1360 = vperm.xlu2 %1604, %v1290_v39   ;;  %v1281_v1 = vsel %vm1025_vm4, %v1110_v19, 0.0  ;;  %v1095_v36 = vsel %vm1092_vm7, %v1094_v35, %v1090_v32  ;;  %v1060_v44 = vsel %vm1059_vm11, %v1647_v11, %v1056_v34  ;;  %v1041_v39 = vadd.f32 %v1649_v28, %v1040_v46  ;;  %v551_v34 = vld [vmem:[%s1742_s20 + $0x48] sm:$0xff]  ;;  %v545_v46 = vld [vmem:[%s1742_s20 + $0x18] sm:$0xff] }
 0x5e5   : > { %v1280_v42 = vsel %vm1024_vm9, %v1095_v36, 0.0  ;;  %v1065_v50 = vsel %vm1062_vm12, %v1064_v48, %v1060_v44  ;;  %vm1047_vm1 = vcmp.eq.f32.partialorder %v1046_v51, 8.507059e+37  ;;  %vm1021_vm2 = vcmp.gt.f32.partialorder %v1872_v24, 0.0  ;;  %v557_v36 = vld [vmem:[%s1742_s20 + $0x78] sm:$0xff]  ;;  %v546_v44 = vld [vmem:[%s1742_s20 + $0x20] sm:$0xff] }
 0x5e6   : > { %v1278_v2 = vsel %vm1022_vm14, %v1065_v50, 0.0  ;;  %v1045_v3 = vsel %vm1044_vm0, %v1649_v28, %v1041_v39  ;;  %v1418_v51 = vld [vmem:[%s2052_s6] sm:$0xff] }
 0x5e7   : > { %v1050_v55 = vsel %vm1047_vm1, %v1049_v54, %v1045_v3  ;;  %v1419_v54 = vld [vmem:[%s2052_s6 + $0x8] sm:$0xff] }
 0x5e8   : > { %v1277_v58 = vsel %vm1021_vm2, %v1050_v55, 0.0 }
 0x5e9   : > { %v935_v57 = vpop.f32.mrf.mxu3 }
 0x5ec   : > { %1365 = vperm.xlu2 %1604, %v1291_v62  }
 0x5ee   : > { %v1306_v32 = vpop.permute.xlu0 %1305 }
 0x5f1   : > { %v938_v59 = vpop.f32.mrf.mxu3 }
 0x5f4   : > { %1370 = vperm.xlu2 %1604, %v1292_v13  }
 0x5f9   : > { %v941_v62 = vpop.f32.mrf.mxu3 }
 0x5fc   : > { %1315 = vperm.xlu2 %1604, %v1281_v1  }
 0x601   : > { %v944_v6 = vpop.f32.mrf.mxu3 }
 0x604   : > { %1310 = vperm.xlu2 %1604, %v1280_v42   ;;  %v548_v42 = vld [vmem:[%s1742_s20 + $0x30] sm:$0xff] }
 0x606   : > { %v1336_v47 = vpop.permute.xlu2 %1335 }
 0x607   : > { %v1381_v49 = vmul.f32 %v1336_v47, %v932_v45  ;;  %v543_v45 = vld [vmem:[%s1742_s20 + $0x8] sm:$0xff]  ;;  %v542_v47 = vld [vmem:[%s1742_s20] sm:$0xff] }
 0x609   : > { %v947_v5 = vpop.f32.mrf.mxu3 }
 0x60c   : > { %1300 = vperm.xlu2 %1604, %v1278_v2  }
 0x60e   : > { %v1331_v53 = vpop.permute.xlu2 %1330 }
 0x60f   : > { %v1380_v20 = vmul.f32 %v1331_v53, %v1993_v30  ;;  %v1375_v30 = vmul.f32 %v1306_v32, %v1945_v9  ;;  %v555_v9 = vld [vmem:[%s1742_s20 + $0x68] sm:$0xff] }
 0x611   : > { %v950_v10 = vpop.f32.mrf.mxu3 }
 0x614   : > { %1295 = vperm.xlu2 %1604, %v1277_v58  }
 0x616   : > { %v1326_v25 = vpop.permute.xlu2 %1325 }
 0x617   : > { %v1379_v1 = vmul.f32 %v1326_v25, %v1982_v61 }
 0x619   : > { %v953_v12 = vpop.f32.mrf.mxu3 }
 0x61e   : > { %v1321_v60 = vpop.permute.xlu2 %1320 }
 0x61f   : > { %v1378_v29 = vmul.f32 %v1321_v60, %v1974_v52 }
 0x626   : > { %v1346_v63 = vpop.permute.xlu2 %1345  ;;  %v1341_v19 = vpop.permute.xlu1 %1340 }
 0x627   : > { %v1383_v21 = vmul.f32 %v1346_v63, %v938_v59  ;;  %v1382_v26 = vmul.f32 %v1341_v19, %v935_v57 }
 0x62e   : > { %v1351_v38 = vpop.permute.xlu2 %1350 }
 0x62f   : > { %v1384_v18 = vmul.f32 %v1351_v38, %v941_v62 }
 0x636   : > { %v1356_v7 = vpop.permute.xlu2 %1355 }
 0x637   : > { %v1385_v16 = vmul.f32 %v1356_v7, %v944_v6 }
 0x63e   : > { %v1361_v8 = vpop.permute.xlu2 %1360 }
 0x63f   : > { %v1386_v24 = vmul.f32 %v1361_v8, %v947_v5 }
 0x646   : > { %v1366_v11 = vpop.permute.xlu2 %1365 }
 0x647   : > { %v1387_v15 = vmul.f32 %v1366_v11, %v950_v10 }
 0x64e   : > { %v1371_v13 = vpop.permute.xlu2 %1370 }
 0x64f   : > { %v1388_v14 = vmul.f32 %v1371_v13, %v953_v12 }
 0x651   : > { %1389 = vmatpush.msra.mxu1 %v1388_v14 }
 0x653   : > { %1390 = vmatpush.msra.mxu1 %v1387_v15 }
 0x655   : > { %1391 = vmatpush.msra.mxu1 %v1386_v24 }
 0x656   : > { %v1316_v17 = vpop.permute.xlu2 %1315 }
 0x657   : > { %1392 = vmatpush.msra.mxu1 %v1385_v16  ;;  %v1377_v31 = vmul.f32 %v1316_v17, %v1965_v41 }
 0x659   : > { %1393 = vmatpush.msra.mxu1 %v1384_v18 }
 0x65b   : > { %1394 = vmatpush.msra.mxu1 %v1383_v21 }
 0x65d   : > { %1395 = vmatpush.msra.mxu1 %v1382_v26 }
 0x65e   : > { %v1311_v28 = vpop.permute.xlu2 %1310 }
 0x65f   : > { %1396 = vmatpush.msra.mxu1 %v1381_v49  ;;  %v1376_v35 = vmul.f32 %v1311_v28, %v1955_v27  ;;  %v556_v27 = vld [vmem:[%s1742_s20 + $0x70] sm:$0xff] }
 0x661   : > { %1397 = vmatpush.msra.mxu1 %v1380_v20 }
 0x663   : > { %1398 = vmatpush.msra.mxu1 %v1379_v1 }
 0x665   : > { %1399 = vmatpush.msra.mxu1 %v1378_v29 }
 0x666   : > { %v1301_v33 = vpop.permute.xlu2 %1300 }
 0x667   : > { %1400 = vmatpush.msra.mxu1 %v1377_v31  ;;  %v1374_v61 = vmul.f32 %v1301_v33, %v1869_v23  ;;  %v554_v23 = vld [vmem:[%s1742_s20 + $0x60] sm:$0xff] }
 0x669   : > { %1401 = vmatpush.msra.mxu1 %v1376_v35 }
 0x66b   : > { %1402 = vmatpush.msra.mxu1 %v1375_v30 }
 0x66d   : > { %1403 = vmatpush.msra.mxu1 %v1374_v61 }
 0x66e   : > { %v1296_v52 = vpop.permute.xlu2 %1295 }
 0x66f   : > { %v1373_v41 = vmul.f32 %v1296_v52, %v1866_v22  ;;  %v552_v22 = vld [vmem:[%s1742_s20 + $0x50] sm:$0xff] }
 0x671   : > { %1404 = vmatpush.msra.mxu1 %v1373_v41 }
 0x672   : > { %1405 = vmatmul.f32.vlgmr.msra.gmra.mxu1 %v1830_v56  ;;  %v550_v56 = vld [vmem:[%s1742_s20 + $0x40] sm:$0xff] }
 0x673   : > { %1420 = vmatpush.msrb.mxu1 %v557_v36 }
 0x675   : > { %1421 = vmatpush.msrb.mxu1 %v556_v27 }
 0x677   : > { %1422 = vmatpush.msrb.mxu1 %v555_v9 }
 0x679   : > { %1423 = vmatpush.msrb.mxu1 %v554_v23 }
 0x67a   : > { %1408 = vmatmul.f32.gmra.mxu1 %v1833_v4  ;;  %v544_v4 = vld [vmem:[%s1742_s20 + $0x10] sm:$0xff] }
 0x67b   : > { %1424 = vmatpush.msrb.mxu1 %v553_v37 }
 0x67d   : > { %1425 = vmatpush.msrb.mxu1 %v552_v22 }
 0x67f   : > { %1426 = vmatpush.msrb.mxu1 %v551_v34 }
 0x681   : > { %1427 = vmatpush.msrb.mxu1 %v550_v56 }
 0x683   : > { %1428 = vmatpush.msrb.mxu1 %v549_v40 }
 0x685   : > { %1429 = vmatpush.msrb.mxu1 %v548_v42 }
 0x687   : > { %1430 = vmatpush.msrb.mxu1 %v547_v43 }
 0x689   : > { %1431 = vmatpush.msrb.mxu1 %v546_v44 }
 0x68b   : > { %1432 = vmatpush.msrb.mxu1 %v545_v46 }
 0x68d   : > { %1433 = vmatpush.msrb.mxu1 %v544_v4 }
 0x68f   : > { %1434 = vmatpush.msrb.mxu1 %v543_v45 }
 0x691   : > { %1435 = vmatpush.msrb.mxu1 %v542_v47 }
 0x6ef   : > { %v1406_v48 = vpop.f32.mrf.mxu1 }
 0x6f0   : > { %vm1412_vm3 = vcmp.ge.f32.partialorder %v1406_v48, 0.0  ;;  %v1414_v49 = vmul.f32 0.1, %v1406_v48 }
 0x6f2   : > { %v1416_v50 = vsel %vm1412_vm3, %v1406_v48, %v1414_v49 }
 0x6f3   : > { %1436 = vmatmul.f32.vlgmr.msrb.gmra.mxu1 %v1416_v50 }
 0x6f7   : > { %v1409_v39 = vpop.f32.mrf.mxu1 }
 0x6f8   : > { %v1415_v0 = vmul.f32 0.1, %v1409_v39  ;;  %vm1413_vm4 = vcmp.ge.f32.partialorder %v1409_v39, 0.0 }
 0x6fa   : > { %v1417_v2 = vsel %vm1413_vm4, %v1409_v39, %v1415_v0 }
 0x6fb   : > { %1439 = vmatmul.f32.gmra.mxu1 %v1417_v2 }
 0x770   : > { %v1437_v3 = vpop.f32.mrf.mxu1 }
 0x771   : > { %v1443_v53 = vadd.f32 %v1437_v3, %v1418_v51 }
 0x773   : > { %1445 = vst [vmem:[%s2052_s6] sm:$0xff] %v1443_v53 }
 0x778   : > { %v1440_v55 = vpop.f32.mrf.mxu1 }
 0x779   : > { %v1444_v57 = vadd.f32 %v1440_v55, %v1419_v54 }
 0x77b   : > { %1446 = vst [vmem:[%s2052_s6 + $0x8] sm:$0xff] %v1444_v57 }
 0x77c PF: > { %s16_s21 = sadd.s32 1, %s1656_s21  }
 0x77d   : > { %p13_p5 = scmp.ge.s32.totalorder %s16_s21, 6  }
 0x77f   :  { %15 = sbr.rel (!%p13_p5) target bundleno = 1 (0x1), region = 83 }

</bundles_post_ra>
